<compile_context>
chip_gen: v7x
topology: tpu7x:2x2x1
jax: 0.10.0
libtpu: 0.0.40
codegen_flags: <defaults>
</compile_context>

<pallas_src>
import math

import jax
import jax.numpy as jnp
from jax.experimental import pallas as pl
from jax.experimental.pallas import tpu as pltpu

# ----------------------------- model config ---------------------------------
NUM_STOCKS = 3
FEATURES_PER_STOCK = 10
D_MODEL = NUM_STOCKS * FEATURES_PER_STOCK          # 30
NUM_HEADS = 5
HEAD_DIM = D_MODEL // NUM_HEADS                    # 6
NUM_LAYERS = 2
HIDDEN_DIM = 128                                   # dim_feedforward
LN_EPS = 1e-5
HEAD_SCALE = 1.0 / math.sqrt(HEAD_DIM)

BATCH = 2
SEQ = 8
N_TOKENS = BATCH * SEQ                             # 16 (collapsed B*S)

# --------------------- packed weight-slab row layout -------------------------
# One (SLAB_ROWS, 128) f32 slab holds every parameter; all block starts are
# multiples of 8 (sublane-tile aligned).  Widths < 128 are zero-padded.
PE_ROW = 0                      # 8 rows,  width 30
FC_W_ROW = 8                    # 3 rows,  width 30
FC_B_ROW = 11                   # 1 row,   width 3
LAYER0_ROW = 16
L_QKV_W = 0                     # 30 rows, width 90  : fused (D, 3*D) QKV weight
L_QKV_B = 32                    # 1 row,   width 90  : fused QKV bias
L_WO = 40                       # 5 heads x 8 rows, width 30 (6 rows used/head)
L_W1T = 80                      # 30 rows, width 128 : linear1.weight.T
L_B1 = 112                      # 1 row,   width 128 : linear1.bias
L_W2T = 120                     # 128 rows, width 30 : linear2.weight.T
L_VEC = 248                     # 6 rows,  width 30  : out_b, ln1_g, ln1_b,
                                #                      l2_b, ln2_g, ln2_b
LAYER_STRIDE = 256
SLAB_ROWS = LAYER0_ROW + NUM_LAYERS * LAYER_STRIDE  # 528
SLAB_COLS = 128


# ------------------------------- kernel -------------------------------------
def _layernorm(xf, gamma, beta):
    # xf: (N, D), gamma/beta: (1, D)
    mu = jnp.mean(xf, axis=-1, keepdims=True)
    d = xf - mu
    var = jnp.mean(d * d, axis=-1, keepdims=True)
    return d * jax.lax.rsqrt(var + LN_EPS) * gamma + beta


def transformer_kernel(x_ref, w_ref, o_ref):
    D, H, HD = D_MODEL, NUM_HEADS, HEAD_DIM

    # positional encoding + collapse (B, S) -> N once.
    pe = w_ref[PE_ROW:PE_ROW + SEQ, 0:D]                       # (S, D)
    x = x_ref[...].astype(jnp.float32) + pe[None, :, :]        # (B, S, D)
    xf = x.reshape(N_TOKENS, D)                                # (N, D)

    for l in range(NUM_LAYERS):
        base = LAYER0_ROW + l * LAYER_STRIDE

        # ------------- multi-head self attention (post-norm) ----------------
        # ONE fused QKV matmul (q-scale pre-folded into the weights).
        w_qkv = w_ref[base + L_QKV_W: base + L_QKV_W + D, 0:3 * D]   # (30, 90)
        b_qkv = w_ref[base + L_QKV_B: base + L_QKV_B + 1, 0:3 * D]   # (1, 90)
        qkv = jnp.dot(xf, w_qkv, preferred_element_type=jnp.float32) + b_qkv

        attn = None
        for h in range(H):
            off = 3 * HD * h                                   # (h, q/k/v, e) cols
            q = qkv[:, off:off + HD].reshape(BATCH, SEQ, HD)
            k = qkv[:, off + HD:off + 2 * HD].reshape(BATCH, SEQ, HD)
            v = qkv[:, off + 2 * HD:off + 3 * HD].reshape(BATCH, SEQ, HD)

            s = jnp.einsum("bqe,bke->bqk", q, k,
                           preferred_element_type=jnp.float32)       # (B, S, S)
            s = s - jnp.max(s, axis=-1, keepdims=True)
            p = jnp.exp(s)
            den = jnp.sum(p, axis=-1, keepdims=True)
            r = pl.reciprocal(den, approx=True)
            r = r * (2.0 - den * r)          # one Newton step -> ~exact softmax
            ctx = jnp.einsum("bqk,bke->bqe", p * r, v,
                             preferred_element_type=jnp.float32)     # (B, S, HD)

            # head merge folded into the per-head output projection (accumulate).
            wo = w_ref[base + L_WO + 8 * h: base + L_WO + 8 * h + HD, 0:D]  # (6, 30)
            part = jnp.dot(ctx.reshape(N_TOKENS, HD), wo,
                           preferred_element_type=jnp.float32)       # (N, D)
            attn = part if attn is None else attn + part

        vec6 = w_ref[base + L_VEC: base + L_VEC + 6, 0:D]      # (6, 30)
        attn = attn + vec6[0:1, :]                             # out_proj.bias
        xf = _layernorm(xf + attn, vec6[1:2, :], vec6[2:3, :])

        # ---------------------------- feed-forward ---------------------------
        w1t = w_ref[base + L_W1T: base + L_W1T + D, :]         # (30, 128)
        b1 = w_ref[base + L_B1: base + L_B1 + 1, :]            # (1, 128)
        h1 = jnp.maximum(
            jnp.dot(xf, w1t, preferred_element_type=jnp.float32) + b1, 0.0)
        w2t = w_ref[base + L_W2T: base + L_W2T + HIDDEN_DIM, 0:D]    # (128, 30)
        ff = jnp.dot(h1, w2t, preferred_element_type=jnp.float32) + vec6[3:4, :]
        xf = _layernorm(xf + ff, vec6[4:5, :], vec6[5:6, :])

    # ------------------ final linear on the last timestep --------------------
    last = xf.reshape(BATCH, SEQ, D)[:, SEQ - 1, :]            # (B, D)
    fc_w = w_ref[FC_W_ROW:FC_W_ROW + NUM_STOCKS, 0:D]          # (stocks, D)
    fc_b = w_ref[FC_B_ROW:FC_B_ROW + 1, 0:NUM_STOCKS]          # (1, stocks)
    out = jnp.einsum("bd,sd->bs", last, fc_w,
                     preferred_element_type=jnp.float32) + fc_b
    o_ref[...] = out.astype(o_ref.dtype)


# ------------------------------- wrapper -------------------------------------
def pack_weights(params):
    """Pack all PyTorch-layout params into one (SLAB_ROWS, 128) f32 slab."""
    D, H, HD, L = D_MODEL, NUM_HEADS, HEAD_DIM, NUM_LAYERS
    slab = jnp.zeros((SLAB_ROWS, SLAB_COLS), jnp.float32)

    slab = slab.at[PE_ROW:PE_ROW + SEQ, 0:D].set(params["pe"])
    slab = slab.at[FC_W_ROW:FC_W_ROW + NUM_STOCKS, 0:D].set(params["fc_w"])
    slab = slab.at[FC_B_ROW, 0:NUM_STOCKS].set(params["fc_b"])

    # fold the 1/sqrt(head_dim) attention scale into Wq / bq.
    scale_vec = jnp.concatenate(
        [jnp.full((D,), HEAD_SCALE, jnp.float32), jnp.ones((2 * D,), jnp.float32)])

    for l in range(L):
        base = LAYER0_ROW + l * LAYER_STRIDE

        in_w = params["in_w"][l] * scale_vec[:, None]          # (90, 30)
        in_b = params["in_b"][l] * scale_vec                   # (90,)
        # reorder rows (q/k/v, head, e) -> (head, q/k/v, e); transpose -> (D, 90)
        w_qkv = in_w.reshape(3, H, HD, D).transpose(1, 0, 2, 3).reshape(3 * D, D).T
        b_qkv = in_b.reshape(3, H, HD).transpose(1, 0, 2).reshape(3 * D)
        slab = slab.at[base + L_QKV_W: base + L_QKV_W + D, 0:3 * D].set(w_qkv)
        slab = slab.at[base + L_QKV_B, 0:3 * D].set(b_qkv)

        wo_t = params["out_w"][l].T                            # (D_in, D_out)
        for h in range(H):
            slab = slab.at[base + L_WO + 8 * h: base + L_WO + 8 * h + HD, 0:D].set(
                wo_t[h * HD:(h + 1) * HD, :])

        slab = slab.at[base + L_W1T: base + L_W1T + D, 0:HIDDEN_DIM].set(
            params["l1_w"][l].T)                               # (30, 128)
        slab = slab.at[base + L_B1, 0:HIDDEN_DIM].set(params["l1_b"][l])
        slab = slab.at[base + L_W2T: base + L_W2T + HIDDEN_DIM, 0:D].set(
            params["l2_w"][l].T)                               # (128, 30)

        vec6 = jnp.stack([params["out_b"][l], params["ln1_g"][l],
                          params["ln1_b"][l], params["l2_b"][l],
                          params["ln2_g"][l], params["ln2_b"][l]], axis=0)
        slab = slab.at[base + L_VEC: base + L_VEC + 6, 0:D].set(vec6)

    return slab


def transformer_stock_predictor(x, weight_slab):
    assert x.shape == (BATCH, SEQ, D_MODEL)
    assert weight_slab.shape == (SLAB_ROWS, SLAB_COLS)
    vmem = pl.BlockSpec(memory_space=pltpu.MemorySpace.VMEM)
    return pl.pallas_call(
        transformer_kernel,
        out_shape=jax.ShapeDtypeStruct((BATCH, NUM_STOCKS), jnp.float32),
        in_specs=[vmem, vmem],
        out_specs=vmem,
        # grid=() on purpose: total resident footprint < 0.5 MiB on every
        # generation; per-grid-step overhead (~0.35 us) would dominate.
    )(x, weight_slab)


# ---------------------------- param / pe setup --------------------------------
def make_positional_encoding(seq_len, d_model):
    position = jnp.arange(seq_len, dtype=jnp.float32)[:, None]
    div_term = jnp.exp(jnp.arange(0, d_model, 2, dtype=jnp.float32)
                       * (-math.log(10000.0) / d_model))
    pe = jnp.zeros((seq_len, d_model), dtype=jnp.float32)
    pe = pe.at[:, 0::2].set(jnp.sin(position * div_term))
    pe = pe.at[:, 1::2].set(jnp.cos(position * div_term))
    return pe


def init_params(key):
    """PyTorch-layout parameters (nn.TransformerEncoderLayer naming)."""
    def nrm(k, shape, scale=0.05):
        return scale * jax.random.normal(k, shape, dtype=jnp.float32)

    keys = jax.random.split(key, 16)
    L, D, H = NUM_LAYERS, D_MODEL, HIDDEN_DIM
    return {
        "pe": make_positional_encoding(SEQ, D),
        "in_w": nrm(keys[0], (L, 3 * D, D)),      # in_proj_weight
        "in_b": nrm(keys[1], (L, 3 * D)),         # in_proj_bias
        "out_w": nrm(keys[2], (L, D, D)),         # out_proj.weight
        "out_b": nrm(keys[3], (L, D)),            # out_proj.bias
        "ln1_g": jnp.ones((L, D), jnp.float32),
        "ln1_b": jnp.zeros((L, D), jnp.float32),
        "ln2_g": jnp.ones((L, D), jnp.float32),
        "ln2_b": jnp.zeros((L, D), jnp.float32),
        "l1_w": nrm(keys[4], (L, H, D)),          # linear1.weight
        "l1_b": nrm(keys[5], (L, H)),
        "l2_w": nrm(keys[6], (L, D, H)),          # linear2.weight
        "l2_b": nrm(keys[7], (L, D)),
        "fc_w": nrm(keys[8], (NUM_STOCKS, D)),
        "fc_b": nrm(keys[9], (NUM_STOCKS,)),
    }


# --------------------------------- main --------------------------------------
if __name__ == "__main__":
    key = jax.random.PRNGKey(0)
    k_params, k_x = jax.random.split(key)
    params = init_params(k_params)
    weight_slab = pack_weights(params)
    x = jax.random.normal(k_x, (BATCH, SEQ, D_MODEL), dtype=jnp.float32)

    out = transformer_stock_predictor(x, weight_slab)
    jax.block_until_ready(out)
    assert out.shape == (BATCH, NUM_STOCKS)
    print("KERNEL_OK")
</pallas_src>

<mosaic_0001>
module attributes {stable_mosaic.version = 11 : i64} {
  func.func @transformer_kernel(%arg0: memref<2x8x30xf32, #tpu.memory_space<vmem>>, %arg1: memref<528x128xf32, #tpu.memory_space<vmem>>, %arg2: memref<2x3xf32, #tpu.memory_space<vmem>>) attributes {dimension_semantics = [], scalar_prefetch = 0 : i64, scratch_operands = 0 : i64, tpu.core_type = #tpu.core_type<tc>} {
    %c0 = arith.constant 0 : index
    %c0_0 = arith.constant 0 : index
    %0 = vector.load %arg1[%c0, %c0_0] : memref<528x128xf32, #tpu.memory_space<vmem>>, vector<8x30xf32>
    %c0_1 = arith.constant 0 : index
    %c0_2 = arith.constant 0 : index
    %c0_3 = arith.constant 0 : index
    %1 = vector.load %arg0[%c0_1, %c0_2, %c0_3] : memref<2x8x30xf32, #tpu.memory_space<vmem>>, vector<2x8x30xf32>
    %2 = vector.shape_cast %0 : vector<8x30xf32> to vector<1x8x30xf32>
    %3 = vector.broadcast %2 : vector<1x8x30xf32> to vector<2x8x30xf32>
    %4 = arith.addf %1, %3 : vector<2x8x30xf32>
    %5 = vector.shape_cast %4 : vector<2x8x30xf32> to vector<16x30xf32>
    %c16 = arith.constant 16 : index
    %c0_4 = arith.constant 0 : index
    %6 = vector.load %arg1[%c16, %c0_4] : memref<528x128xf32, #tpu.memory_space<vmem>>, vector<30x90xf32>
    %c48 = arith.constant 48 : index
    %c0_5 = arith.constant 0 : index
    %7 = vector.load %arg1[%c48, %c0_5] : memref<528x128xf32, #tpu.memory_space<vmem>>, vector<1x90xf32>
    %cst = arith.constant dense<0.000000e+00> : vector<16x90xf32>
    %8 = tpu.matmul %5, %6, %cst {dimension_numbers = #tpu.dot_dimension_numbers<[1], [0], [0], [1], [0, 0, 1, 1], [], []>} : vector<16x30xf32>, vector<30x90xf32>, vector<16x90xf32> -> vector<16x90xf32>
    %9 = vector.broadcast %7 : vector<1x90xf32> to vector<16x90xf32>
    %10 = arith.addf %8, %9 : vector<16x90xf32>
    %11 = vector.extract_strided_slice %10 {offsets = [0, 0], sizes = [16, 6], strides = [1, 1]} : vector<16x90xf32> to vector<16x6xf32>
    %12 = vector.shape_cast %11 : vector<16x6xf32> to vector<2x8x6xf32>
    %13 = vector.extract_strided_slice %10 {offsets = [0, 6], sizes = [16, 6], strides = [1, 1]} : vector<16x90xf32> to vector<16x6xf32>
    %14 = vector.shape_cast %13 : vector<16x6xf32> to vector<2x8x6xf32>
    %15 = vector.extract_strided_slice %10 {offsets = [0, 12], sizes = [16, 6], strides = [1, 1]} : vector<16x90xf32> to vector<16x6xf32>
    %16 = vector.shape_cast %15 : vector<16x6xf32> to vector<2x8x6xf32>
    "tpu.trace_start"() <{level = 10 : i32, message = "bqe,bke->bqk"}> : () -> ()
    %cst_6 = arith.constant dense<0.000000e+00> : vector<2x8x8xf32>
    %17 = tpu.matmul %12, %14, %cst_6 {dimension_numbers = #tpu.dot_dimension_numbers<[2], [2], [1], [1], [0, 0, 0, 1, 1, 1], [0], [0]>} : vector<2x8x6xf32>, vector<2x8x6xf32>, vector<2x8x8xf32> -> vector<2x8x8xf32>
    "tpu.trace_stop"() : () -> ()
    %cst_7 = arith.constant dense<0xFF800000> : vector<2x8xf32>
    %18 = vector.multi_reduction <maximumf>, %17, %cst_7 [2] : vector<2x8x8xf32> to vector<2x8xf32>
    %19 = vector.shape_cast %18 : vector<2x8xf32> to vector<2x8x1xf32>
    %20 = vector.broadcast %19 : vector<2x8x1xf32> to vector<2x8x8xf32>
    %21 = arith.subf %17, %20 : vector<2x8x8xf32>
    %22 = math.exp %21 : vector<2x8x8xf32>
    %cst_8 = arith.constant dense<0.000000e+00> : vector<2x8xf32>
    %23 = vector.multi_reduction <add>, %22, %cst_8 [2] : vector<2x8x8xf32> to vector<2x8xf32>
    %24 = vector.shape_cast %23 : vector<2x8xf32> to vector<2x8x1xf32>
    %25 = tpu.reciprocal %24 {approx = true} : vector<2x8x1xf32> -> vector<2x8x1xf32>
    %26 = arith.mulf %24, %25 : vector<2x8x1xf32>
    %cst_9 = arith.constant 2.000000e+00 : f32
    %27 = vector.broadcast %cst_9 : f32 to vector<2x8x1xf32>
    %28 = arith.subf %27, %26 : vector<2x8x1xf32>
    %29 = arith.mulf %25, %28 : vector<2x8x1xf32>
    %30 = vector.broadcast %29 : vector<2x8x1xf32> to vector<2x8x8xf32>
    %31 = arith.mulf %22, %30 : vector<2x8x8xf32>
    "tpu.trace_start"() <{level = 10 : i32, message = "bqk,bke->bqe"}> : () -> ()
    %cst_10 = arith.constant dense<0.000000e+00> : vector<2x8x6xf32>
    %32 = tpu.matmul %31, %16, %cst_10 {dimension_numbers = #tpu.dot_dimension_numbers<[2], [1], [1], [2], [0, 0, 0, 1, 1, 2], [0], [0]>} : vector<2x8x8xf32>, vector<2x8x6xf32>, vector<2x8x6xf32> -> vector<2x8x6xf32>
    "tpu.trace_stop"() : () -> ()
    %c56 = arith.constant 56 : index
    %c0_11 = arith.constant 0 : index
    %33 = vector.load %arg1[%c56, %c0_11] : memref<528x128xf32, #tpu.memory_space<vmem>>, vector<6x30xf32>
    %34 = vector.shape_cast %32 : vector<2x8x6xf32> to vector<16x6xf32>
    %cst_12 = arith.constant dense<0.000000e+00> : vector<16x30xf32>
    %35 = tpu.matmul %34, %33, %cst_12 {dimension_numbers = #tpu.dot_dimension_numbers<[1], [0], [0], [1], [0, 0, 1, 1], [], []>} : vector<16x6xf32>, vector<6x30xf32>, vector<16x30xf32> -> vector<16x30xf32>
    %36 = vector.extract_strided_slice %10 {offsets = [0, 18], sizes = [16, 6], strides = [1, 1]} : vector<16x90xf32> to vector<16x6xf32>
    %37 = vector.shape_cast %36 : vector<16x6xf32> to vector<2x8x6xf32>
    %38 = vector.extract_strided_slice %10 {offsets = [0, 24], sizes = [16, 6], strides = [1, 1]} : vector<16x90xf32> to vector<16x6xf32>
    %39 = vector.shape_cast %38 : vector<16x6xf32> to vector<2x8x6xf32>
    %40 = vector.extract_strided_slice %10 {offsets = [0, 30], sizes = [16, 6], strides = [1, 1]} : vector<16x90xf32> to vector<16x6xf32>
    %41 = vector.shape_cast %40 : vector<16x6xf32> to vector<2x8x6xf32>
    "tpu.trace_start"() <{level = 10 : i32, message = "bqe,bke->bqk"}> : () -> ()
    %cst_13 = arith.constant dense<0.000000e+00> : vector<2x8x8xf32>
    %42 = tpu.matmul %37, %39, %cst_13 {dimension_numbers = #tpu.dot_dimension_numbers<[2], [2], [1], [1], [0, 0, 0, 1, 1, 1], [0], [0]>} : vector<2x8x6xf32>, vector<2x8x6xf32>, vector<2x8x8xf32> -> vector<2x8x8xf32>
    "tpu.trace_stop"() : () -> ()
    %cst_14 = arith.constant dense<0xFF800000> : vector<2x8xf32>
    %43 = vector.multi_reduction <maximumf>, %42, %cst_14 [2] : vector<2x8x8xf32> to vector<2x8xf32>
    %44 = vector.shape_cast %43 : vector<2x8xf32> to vector<2x8x1xf32>
    %45 = vector.broadcast %44 : vector<2x8x1xf32> to vector<2x8x8xf32>
    %46 = arith.subf %42, %45 : vector<2x8x8xf32>
    %47 = math.exp %46 : vector<2x8x8xf32>
    %cst_15 = arith.constant dense<0.000000e+00> : vector<2x8xf32>
    %48 = vector.multi_reduction <add>, %47, %cst_15 [2] : vector<2x8x8xf32> to vector<2x8xf32>
    %49 = vector.shape_cast %48 : vector<2x8xf32> to vector<2x8x1xf32>
    %50 = tpu.reciprocal %49 {approx = true} : vector<2x8x1xf32> -> vector<2x8x1xf32>
    %51 = arith.mulf %49, %50 : vector<2x8x1xf32>
    %cst_16 = arith.constant 2.000000e+00 : f32
    %52 = vector.broadcast %cst_16 : f32 to vector<2x8x1xf32>
    %53 = arith.subf %52, %51 : vector<2x8x1xf32>
    %54 = arith.mulf %50, %53 : vector<2x8x1xf32>
    %55 = vector.broadcast %54 : vector<2x8x1xf32> to vector<2x8x8xf32>
    %56 = arith.mulf %47, %55 : vector<2x8x8xf32>
    "tpu.trace_start"() <{level = 10 : i32, message = "bqk,bke->bqe"}> : () -> ()
    %cst_17 = arith.constant dense<0.000000e+00> : vector<2x8x6xf32>
    %57 = tpu.matmul %56, %41, %cst_17 {dimension_numbers = #tpu.dot_dimension_numbers<[2], [1], [1], [2], [0, 0, 0, 1, 1, 2], [0], [0]>} : vector<2x8x8xf32>, vector<2x8x6xf32>, vector<2x8x6xf32> -> vector<2x8x6xf32>
    "tpu.trace_stop"() : () -> ()
    %c64 = arith.constant 64 : index
    %c0_18 = arith.constant 0 : index
    %58 = vector.load %arg1[%c64, %c0_18] : memref<528x128xf32, #tpu.memory_space<vmem>>, vector<6x30xf32>
    %59 = vector.shape_cast %57 : vector<2x8x6xf32> to vector<16x6xf32>
    %cst_19 = arith.constant dense<0.000000e+00> : vector<16x30xf32>
    %60 = tpu.matmul %59, %58, %cst_19 {dimension_numbers = #tpu.dot_dimension_numbers<[1], [0], [0], [1], [0, 0, 1, 1], [], []>} : vector<16x6xf32>, vector<6x30xf32>, vector<16x30xf32> -> vector<16x30xf32>
    %61 = arith.addf %35, %60 : vector<16x30xf32>
    %62 = vector.extract_strided_slice %10 {offsets = [0, 36], sizes = [16, 6], strides = [1, 1]} : vector<16x90xf32> to vector<16x6xf32>
    %63 = vector.shape_cast %62 : vector<16x6xf32> to vector<2x8x6xf32>
    %64 = vector.extract_strided_slice %10 {offsets = [0, 42], sizes = [16, 6], strides = [1, 1]} : vector<16x90xf32> to vector<16x6xf32>
    %65 = vector.shape_cast %64 : vector<16x6xf32> to vector<2x8x6xf32>
    %66 = vector.extract_strided_slice %10 {offsets = [0, 48], sizes = [16, 6], strides = [1, 1]} : vector<16x90xf32> to vector<16x6xf32>
    %67 = vector.shape_cast %66 : vector<16x6xf32> to vector<2x8x6xf32>
    "tpu.trace_start"() <{level = 10 : i32, message = "bqe,bke->bqk"}> : () -> ()
    %cst_20 = arith.constant dense<0.000000e+00> : vector<2x8x8xf32>
    %68 = tpu.matmul %63, %65, %cst_20 {dimension_numbers = #tpu.dot_dimension_numbers<[2], [2], [1], [1], [0, 0, 0, 1, 1, 1], [0], [0]>} : vector<2x8x6xf32>, vector<2x8x6xf32>, vector<2x8x8xf32> -> vector<2x8x8xf32>
    "tpu.trace_stop"() : () -> ()
    %cst_21 = arith.constant dense<0xFF800000> : vector<2x8xf32>
    %69 = vector.multi_reduction <maximumf>, %68, %cst_21 [2] : vector<2x8x8xf32> to vector<2x8xf32>
    %70 = vector.shape_cast %69 : vector<2x8xf32> to vector<2x8x1xf32>
    %71 = vector.broadcast %70 : vector<2x8x1xf32> to vector<2x8x8xf32>
    %72 = arith.subf %68, %71 : vector<2x8x8xf32>
    %73 = math.exp %72 : vector<2x8x8xf32>
    %cst_22 = arith.constant dense<0.000000e+00> : vector<2x8xf32>
    %74 = vector.multi_reduction <add>, %73, %cst_22 [2] : vector<2x8x8xf32> to vector<2x8xf32>
    %75 = vector.shape_cast %74 : vector<2x8xf32> to vector<2x8x1xf32>
    %76 = tpu.reciprocal %75 {approx = true} : vector<2x8x1xf32> -> vector<2x8x1xf32>
    %77 = arith.mulf %75, %76 : vector<2x8x1xf32>
    %cst_23 = arith.constant 2.000000e+00 : f32
    %78 = vector.broadcast %cst_23 : f32 to vector<2x8x1xf32>
    %79 = arith.subf %78, %77 : vector<2x8x1xf32>
    %80 = arith.mulf %76, %79 : vector<2x8x1xf32>
    %81 = vector.broadcast %80 : vector<2x8x1xf32> to vector<2x8x8xf32>
    %82 = arith.mulf %73, %81 : vector<2x8x8xf32>
    "tpu.trace_start"() <{level = 10 : i32, message = "bqk,bke->bqe"}> : () -> ()
    %cst_24 = arith.constant dense<0.000000e+00> : vector<2x8x6xf32>
    %83 = tpu.matmul %82, %67, %cst_24 {dimension_numbers = #tpu.dot_dimension_numbers<[2], [1], [1], [2], [0, 0, 0, 1, 1, 2], [0], [0]>} : vector<2x8x8xf32>, vector<2x8x6xf32>, vector<2x8x6xf32> -> vector<2x8x6xf32>
    "tpu.trace_stop"() : () -> ()
    %c72 = arith.constant 72 : index
    %c0_25 = arith.constant 0 : index
    %84 = vector.load %arg1[%c72, %c0_25] : memref<528x128xf32, #tpu.memory_space<vmem>>, vector<6x30xf32>
    %85 = vector.shape_cast %83 : vector<2x8x6xf32> to vector<16x6xf32>
    %cst_26 = arith.constant dense<0.000000e+00> : vector<16x30xf32>
    %86 = tpu.matmul %85, %84, %cst_26 {dimension_numbers = #tpu.dot_dimension_numbers<[1], [0], [0], [1], [0, 0, 1, 1], [], []>} : vector<16x6xf32>, vector<6x30xf32>, vector<16x30xf32> -> vector<16x30xf32>
    %87 = arith.addf %61, %86 : vector<16x30xf32>
    %88 = vector.extract_strided_slice %10 {offsets = [0, 54], sizes = [16, 6], strides = [1, 1]} : vector<16x90xf32> to vector<16x6xf32>
    %89 = vector.shape_cast %88 : vector<16x6xf32> to vector<2x8x6xf32>
    %90 = vector.extract_strided_slice %10 {offsets = [0, 60], sizes = [16, 6], strides = [1, 1]} : vector<16x90xf32> to vector<16x6xf32>
    %91 = vector.shape_cast %90 : vector<16x6xf32> to vector<2x8x6xf32>
    %92 = vector.extract_strided_slice %10 {offsets = [0, 66], sizes = [16, 6], strides = [1, 1]} : vector<16x90xf32> to vector<16x6xf32>
    %93 = vector.shape_cast %92 : vector<16x6xf32> to vector<2x8x6xf32>
    "tpu.trace_start"() <{level = 10 : i32, message = "bqe,bke->bqk"}> : () -> ()
    %cst_27 = arith.constant dense<0.000000e+00> : vector<2x8x8xf32>
    %94 = tpu.matmul %89, %91, %cst_27 {dimension_numbers = #tpu.dot_dimension_numbers<[2], [2], [1], [1], [0, 0, 0, 1, 1, 1], [0], [0]>} : vector<2x8x6xf32>, vector<2x8x6xf32>, vector<2x8x8xf32> -> vector<2x8x8xf32>
    "tpu.trace_stop"() : () -> ()
    %cst_28 = arith.constant dense<0xFF800000> : vector<2x8xf32>
    %95 = vector.multi_reduction <maximumf>, %94, %cst_28 [2] : vector<2x8x8xf32> to vector<2x8xf32>
    %96 = vector.shape_cast %95 : vector<2x8xf32> to vector<2x8x1xf32>
    %97 = vector.broadcast %96 : vector<2x8x1xf32> to vector<2x8x8xf32>
    %98 = arith.subf %94, %97 : vector<2x8x8xf32>
    %99 = math.exp %98 : vector<2x8x8xf32>
    %cst_29 = arith.constant dense<0.000000e+00> : vector<2x8xf32>
    %100 = vector.multi_reduction <add>, %99, %cst_29 [2] : vector<2x8x8xf32> to vector<2x8xf32>
    %101 = vector.shape_cast %100 : vector<2x8xf32> to vector<2x8x1xf32>
    %102 = tpu.reciprocal %101 {approx = true} : vector<2x8x1xf32> -> vector<2x8x1xf32>
    %103 = arith.mulf %101, %102 : vector<2x8x1xf32>
    %cst_30 = arith.constant 2.000000e+00 : f32
    %104 = vector.broadcast %cst_30 : f32 to vector<2x8x1xf32>
    %105 = arith.subf %104, %103 : vector<2x8x1xf32>
    %106 = arith.mulf %102, %105 : vector<2x8x1xf32>
    %107 = vector.broadcast %106 : vector<2x8x1xf32> to vector<2x8x8xf32>
    %108 = arith.mulf %99, %107 : vector<2x8x8xf32>
    "tpu.trace_start"() <{level = 10 : i32, message = "bqk,bke->bqe"}> : () -> ()
    %cst_31 = arith.constant dense<0.000000e+00> : vector<2x8x6xf32>
    %109 = tpu.matmul %108, %93, %cst_31 {dimension_numbers = #tpu.dot_dimension_numbers<[2], [1], [1], [2], [0, 0, 0, 1, 1, 2], [0], [0]>} : vector<2x8x8xf32>, vector<2x8x6xf32>, vector<2x8x6xf32> -> vector<2x8x6xf32>
    "tpu.trace_stop"() : () -> ()
    %c80 = arith.constant 80 : index
    %c0_32 = arith.constant 0 : index
    %110 = vector.load %arg1[%c80, %c0_32] : memref<528x128xf32, #tpu.memory_space<vmem>>, vector<6x30xf32>
    %111 = vector.shape_cast %109 : vector<2x8x6xf32> to vector<16x6xf32>
    %cst_33 = arith.constant dense<0.000000e+00> : vector<16x30xf32>
    %112 = tpu.matmul %111, %110, %cst_33 {dimension_numbers = #tpu.dot_dimension_numbers<[1], [0], [0], [1], [0, 0, 1, 1], [], []>} : vector<16x6xf32>, vector<6x30xf32>, vector<16x30xf32> -> vector<16x30xf32>
    %113 = arith.addf %87, %112 : vector<16x30xf32>
    %114 = vector.extract_strided_slice %10 {offsets = [0, 72], sizes = [16, 6], strides = [1, 1]} : vector<16x90xf32> to vector<16x6xf32>
    %115 = vector.shape_cast %114 : vector<16x6xf32> to vector<2x8x6xf32>
    %116 = vector.extract_strided_slice %10 {offsets = [0, 78], sizes = [16, 6], strides = [1, 1]} : vector<16x90xf32> to vector<16x6xf32>
    %117 = vector.shape_cast %116 : vector<16x6xf32> to vector<2x8x6xf32>
    %118 = vector.extract_strided_slice %10 {offsets = [0, 84], sizes = [16, 6], strides = [1, 1]} : vector<16x90xf32> to vector<16x6xf32>
    %119 = vector.shape_cast %118 : vector<16x6xf32> to vector<2x8x6xf32>
    "tpu.trace_start"() <{level = 10 : i32, message = "bqe,bke->bqk"}> : () -> ()
    %cst_34 = arith.constant dense<0.000000e+00> : vector<2x8x8xf32>
    %120 = tpu.matmul %115, %117, %cst_34 {dimension_numbers = #tpu.dot_dimension_numbers<[2], [2], [1], [1], [0, 0, 0, 1, 1, 1], [0], [0]>} : vector<2x8x6xf32>, vector<2x8x6xf32>, vector<2x8x8xf32> -> vector<2x8x8xf32>
    "tpu.trace_stop"() : () -> ()
    %cst_35 = arith.constant dense<0xFF800000> : vector<2x8xf32>
    %121 = vector.multi_reduction <maximumf>, %120, %cst_35 [2] : vector<2x8x8xf32> to vector<2x8xf32>
    %122 = vector.shape_cast %121 : vector<2x8xf32> to vector<2x8x1xf32>
    %123 = vector.broadcast %122 : vector<2x8x1xf32> to vector<2x8x8xf32>
    %124 = arith.subf %120, %123 : vector<2x8x8xf32>
    %125 = math.exp %124 : vector<2x8x8xf32>
    %cst_36 = arith.constant dense<0.000000e+00> : vector<2x8xf32>
    %126 = vector.multi_reduction <add>, %125, %cst_36 [2] : vector<2x8x8xf32> to vector<2x8xf32>
    %127 = vector.shape_cast %126 : vector<2x8xf32> to vector<2x8x1xf32>
    %128 = tpu.reciprocal %127 {approx = true} : vector<2x8x1xf32> -> vector<2x8x1xf32>
    %129 = arith.mulf %127, %128 : vector<2x8x1xf32>
    %cst_37 = arith.constant 2.000000e+00 : f32
    %130 = vector.broadcast %cst_37 : f32 to vector<2x8x1xf32>
    %131 = arith.subf %130, %129 : vector<2x8x1xf32>
    %132 = arith.mulf %128, %131 : vector<2x8x1xf32>
    %133 = vector.broadcast %132 : vector<2x8x1xf32> to vector<2x8x8xf32>
    %134 = arith.mulf %125, %133 : vector<2x8x8xf32>
    "tpu.trace_start"() <{level = 10 : i32, message = "bqk,bke->bqe"}> : () -> ()
    %cst_38 = arith.constant dense<0.000000e+00> : vector<2x8x6xf32>
    %135 = tpu.matmul %134, %119, %cst_38 {dimension_numbers = #tpu.dot_dimension_numbers<[2], [1], [1], [2], [0, 0, 0, 1, 1, 2], [0], [0]>} : vector<2x8x8xf32>, vector<2x8x6xf32>, vector<2x8x6xf32> -> vector<2x8x6xf32>
    "tpu.trace_stop"() : () -> ()
    %c88 = arith.constant 88 : index
    %c0_39 = arith.constant 0 : index
    %136 = vector.load %arg1[%c88, %c0_39] : memref<528x128xf32, #tpu.memory_space<vmem>>, vector<6x30xf32>
    %137 = vector.shape_cast %135 : vector<2x8x6xf32> to vector<16x6xf32>
    %cst_40 = arith.constant dense<0.000000e+00> : vector<16x30xf32>
    %138 = tpu.matmul %137, %136, %cst_40 {dimension_numbers = #tpu.dot_dimension_numbers<[1], [0], [0], [1], [0, 0, 1, 1], [], []>} : vector<16x6xf32>, vector<6x30xf32>, vector<16x30xf32> -> vector<16x30xf32>
    %139 = arith.addf %113, %138 : vector<16x30xf32>
    %c264 = arith.constant 264 : index
    %c0_41 = arith.constant 0 : index
    %140 = vector.load %arg1[%c264, %c0_41] : memref<528x128xf32, #tpu.memory_space<vmem>>, vector<6x30xf32>
    %141 = vector.extract_strided_slice %140 {offsets = [0, 0], sizes = [1, 30], strides = [1, 1]} : vector<6x30xf32> to vector<1x30xf32>
    %142 = vector.broadcast %141 : vector<1x30xf32> to vector<16x30xf32>
    %143 = arith.addf %139, %142 : vector<16x30xf32>
    %144 = arith.addf %5, %143 : vector<16x30xf32>
    %145 = vector.extract_strided_slice %140 {offsets = [1, 0], sizes = [1, 30], strides = [1, 1]} : vector<6x30xf32> to vector<1x30xf32>
    %146 = vector.extract_strided_slice %140 {offsets = [2, 0], sizes = [1, 30], strides = [1, 1]} : vector<6x30xf32> to vector<1x30xf32>
    %cst_42 = arith.constant dense<0.000000e+00> : vector<16xf32>
    %147 = vector.multi_reduction <add>, %144, %cst_42 [1] : vector<16x30xf32> to vector<16xf32>
    %148 = vector.shape_cast %147 : vector<16xf32> to vector<16x1xf32>
    %cst_43 = arith.constant 3.000000e+01 : f32
    %149 = vector.broadcast %cst_43 : f32 to vector<16x1xf32>
    %150 = arith.divf %148, %149 : vector<16x1xf32>
    %151 = vector.broadcast %150 : vector<16x1xf32> to vector<16x30xf32>
    %152 = arith.subf %144, %151 : vector<16x30xf32>
    %153 = arith.mulf %152, %152 : vector<16x30xf32>
    %cst_44 = arith.constant dense<0.000000e+00> : vector<16xf32>
    %154 = vector.multi_reduction <add>, %153, %cst_44 [1] : vector<16x30xf32> to vector<16xf32>
    %155 = vector.shape_cast %154 : vector<16xf32> to vector<16x1xf32>
    %cst_45 = arith.constant 3.000000e+01 : f32
    %156 = vector.broadcast %cst_45 : f32 to vector<16x1xf32>
    %157 = arith.divf %155, %156 : vector<16x1xf32>
    %cst_46 = arith.constant 9.99999974E-6 : f32
    %158 = vector.broadcast %cst_46 : f32 to vector<16x1xf32>
    %159 = arith.addf %157, %158 : vector<16x1xf32>
    %160 = math.rsqrt %159 : vector<16x1xf32>
    %161 = vector.broadcast %160 : vector<16x1xf32> to vector<16x30xf32>
    %162 = arith.mulf %152, %161 : vector<16x30xf32>
    %163 = vector.broadcast %145 : vector<1x30xf32> to vector<16x30xf32>
    %164 = arith.mulf %162, %163 : vector<16x30xf32>
    %165 = vector.broadcast %146 : vector<1x30xf32> to vector<16x30xf32>
    %166 = arith.addf %164, %165 : vector<16x30xf32>
    %c96 = arith.constant 96 : index
    %c0_47 = arith.constant 0 : index
    %167 = vector.load %arg1[%c96, %c0_47] : memref<528x128xf32, #tpu.memory_space<vmem>>, vector<30x128xf32>
    %c128 = arith.constant 128 : index
    %c0_48 = arith.constant 0 : index
    %168 = vector.load %arg1[%c128, %c0_48] : memref<528x128xf32, #tpu.memory_space<vmem>>, vector<1x128xf32>
    %cst_49 = arith.constant dense<0.000000e+00> : vector<16x128xf32>
    %169 = tpu.matmul %166, %167, %cst_49 {dimension_numbers = #tpu.dot_dimension_numbers<[1], [0], [0], [1], [0, 0, 1, 1], [], []>} : vector<16x30xf32>, vector<30x128xf32>, vector<16x128xf32> -> vector<16x128xf32>
    %170 = vector.broadcast %168 : vector<1x128xf32> to vector<16x128xf32>
    %171 = arith.addf %169, %170 : vector<16x128xf32>
    %cst_50 = arith.constant 0.000000e+00 : f32
    %172 = vector.broadcast %cst_50 : f32 to vector<16x128xf32>
    %173 = arith.maximumf %171, %172 : vector<16x128xf32>
    %c136 = arith.constant 136 : index
    %c0_51 = arith.constant 0 : index
    %174 = vector.load %arg1[%c136, %c0_51] : memref<528x128xf32, #tpu.memory_space<vmem>>, vector<128x30xf32>
    %cst_52 = arith.constant dense<0.000000e+00> : vector<16x30xf32>
    %175 = tpu.matmul %173, %174, %cst_52 {dimension_numbers = #tpu.dot_dimension_numbers<[1], [0], [0], [1], [0, 0, 1, 1], [], []>} : vector<16x128xf32>, vector<128x30xf32>, vector<16x30xf32> -> vector<16x30xf32>
    %176 = vector.extract_strided_slice %140 {offsets = [3, 0], sizes = [1, 30], strides = [1, 1]} : vector<6x30xf32> to vector<1x30xf32>
    %177 = vector.broadcast %176 : vector<1x30xf32> to vector<16x30xf32>
    %178 = arith.addf %175, %177 : vector<16x30xf32>
    %179 = arith.addf %166, %178 : vector<16x30xf32>
    %180 = vector.extract_strided_slice %140 {offsets = [4, 0], sizes = [1, 30], strides = [1, 1]} : vector<6x30xf32> to vector<1x30xf32>
    %181 = vector.extract_strided_slice %140 {offsets = [5, 0], sizes = [1, 30], strides = [1, 1]} : vector<6x30xf32> to vector<1x30xf32>
    %cst_53 = arith.constant dense<0.000000e+00> : vector<16xf32>
    %182 = vector.multi_reduction <add>, %179, %cst_53 [1] : vector<16x30xf32> to vector<16xf32>
    %183 = vector.shape_cast %182 : vector<16xf32> to vector<16x1xf32>
    %cst_54 = arith.constant 3.000000e+01 : f32
    %184 = vector.broadcast %cst_54 : f32 to vector<16x1xf32>
    %185 = arith.divf %183, %184 : vector<16x1xf32>
    %186 = vector.broadcast %185 : vector<16x1xf32> to vector<16x30xf32>
    %187 = arith.subf %179, %186 : vector<16x30xf32>
    %188 = arith.mulf %187, %187 : vector<16x30xf32>
    %cst_55 = arith.constant dense<0.000000e+00> : vector<16xf32>
    %189 = vector.multi_reduction <add>, %188, %cst_55 [1] : vector<16x30xf32> to vector<16xf32>
    %190 = vector.shape_cast %189 : vector<16xf32> to vector<16x1xf32>
    %cst_56 = arith.constant 3.000000e+01 : f32
    %191 = vector.broadcast %cst_56 : f32 to vector<16x1xf32>
    %192 = arith.divf %190, %191 : vector<16x1xf32>
    %cst_57 = arith.constant 9.99999974E-6 : f32
    %193 = vector.broadcast %cst_57 : f32 to vector<16x1xf32>
    %194 = arith.addf %192, %193 : vector<16x1xf32>
    %195 = math.rsqrt %194 : vector<16x1xf32>
    %196 = vector.broadcast %195 : vector<16x1xf32> to vector<16x30xf32>
    %197 = arith.mulf %187, %196 : vector<16x30xf32>
    %198 = vector.broadcast %180 : vector<1x30xf32> to vector<16x30xf32>
    %199 = arith.mulf %197, %198 : vector<16x30xf32>
    %200 = vector.broadcast %181 : vector<1x30xf32> to vector<16x30xf32>
    %201 = arith.addf %199, %200 : vector<16x30xf32>
    %c272 = arith.constant 272 : index
    %c0_58 = arith.constant 0 : index
    %202 = vector.load %arg1[%c272, %c0_58] : memref<528x128xf32, #tpu.memory_space<vmem>>, vector<30x90xf32>
    %c304 = arith.constant 304 : index
    %c0_59 = arith.constant 0 : index
    %203 = vector.load %arg1[%c304, %c0_59] : memref<528x128xf32, #tpu.memory_space<vmem>>, vector<1x90xf32>
    %cst_60 = arith.constant dense<0.000000e+00> : vector<16x90xf32>
    %204 = tpu.matmul %201, %202, %cst_60 {dimension_numbers = #tpu.dot_dimension_numbers<[1], [0], [0], [1], [0, 0, 1, 1], [], []>} : vector<16x30xf32>, vector<30x90xf32>, vector<16x90xf32> -> vector<16x90xf32>
    %205 = vector.broadcast %203 : vector<1x90xf32> to vector<16x90xf32>
    %206 = arith.addf %204, %205 : vector<16x90xf32>
    %207 = vector.extract_strided_slice %206 {offsets = [0, 0], sizes = [16, 6], strides = [1, 1]} : vector<16x90xf32> to vector<16x6xf32>
    %208 = vector.shape_cast %207 : vector<16x6xf32> to vector<2x8x6xf32>
    %209 = vector.extract_strided_slice %206 {offsets = [0, 6], sizes = [16, 6], strides = [1, 1]} : vector<16x90xf32> to vector<16x6xf32>
    %210 = vector.shape_cast %209 : vector<16x6xf32> to vector<2x8x6xf32>
    %211 = vector.extract_strided_slice %206 {offsets = [0, 12], sizes = [16, 6], strides = [1, 1]} : vector<16x90xf32> to vector<16x6xf32>
    %212 = vector.shape_cast %211 : vector<16x6xf32> to vector<2x8x6xf32>
    "tpu.trace_start"() <{level = 10 : i32, message = "bqe,bke->bqk"}> : () -> ()
    %cst_61 = arith.constant dense<0.000000e+00> : vector<2x8x8xf32>
    %213 = tpu.matmul %208, %210, %cst_61 {dimension_numbers = #tpu.dot_dimension_numbers<[2], [2], [1], [1], [0, 0, 0, 1, 1, 1], [0], [0]>} : vector<2x8x6xf32>, vector<2x8x6xf32>, vector<2x8x8xf32> -> vector<2x8x8xf32>
    "tpu.trace_stop"() : () -> ()
    %cst_62 = arith.constant dense<0xFF800000> : vector<2x8xf32>
    %214 = vector.multi_reduction <maximumf>, %213, %cst_62 [2] : vector<2x8x8xf32> to vector<2x8xf32>
    %215 = vector.shape_cast %214 : vector<2x8xf32> to vector<2x8x1xf32>
    %216 = vector.broadcast %215 : vector<2x8x1xf32> to vector<2x8x8xf32>
    %217 = arith.subf %213, %216 : vector<2x8x8xf32>
    %218 = math.exp %217 : vector<2x8x8xf32>
    %cst_63 = arith.constant dense<0.000000e+00> : vector<2x8xf32>
    %219 = vector.multi_reduction <add>, %218, %cst_63 [2] : vector<2x8x8xf32> to vector<2x8xf32>
    %220 = vector.shape_cast %219 : vector<2x8xf32> to vector<2x8x1xf32>
    %221 = tpu.reciprocal %220 {approx = true} : vector<2x8x1xf32> -> vector<2x8x1xf32>
    %222 = arith.mulf %220, %221 : vector<2x8x1xf32>
    %cst_64 = arith.constant 2.000000e+00 : f32
    %223 = vector.broadcast %cst_64 : f32 to vector<2x8x1xf32>
    %224 = arith.subf %223, %222 : vector<2x8x1xf32>
    %225 = arith.mulf %221, %224 : vector<2x8x1xf32>
    %226 = vector.broadcast %225 : vector<2x8x1xf32> to vector<2x8x8xf32>
    %227 = arith.mulf %218, %226 : vector<2x8x8xf32>
    "tpu.trace_start"() <{level = 10 : i32, message = "bqk,bke->bqe"}> : () -> ()
    %cst_65 = arith.constant dense<0.000000e+00> : vector<2x8x6xf32>
    %228 = tpu.matmul %227, %212, %cst_65 {dimension_numbers = #tpu.dot_dimension_numbers<[2], [1], [1], [2], [0, 0, 0, 1, 1, 2], [0], [0]>} : vector<2x8x8xf32>, vector<2x8x6xf32>, vector<2x8x6xf32> -> vector<2x8x6xf32>
    "tpu.trace_stop"() : () -> ()
    %c312 = arith.constant 312 : index
    %c0_66 = arith.constant 0 : index
    %229 = vector.load %arg1[%c312, %c0_66] : memref<528x128xf32, #tpu.memory_space<vmem>>, vector<6x30xf32>
    %230 = vector.shape_cast %228 : vector<2x8x6xf32> to vector<16x6xf32>
    %cst_67 = arith.constant dense<0.000000e+00> : vector<16x30xf32>
    %231 = tpu.matmul %230, %229, %cst_67 {dimension_numbers = #tpu.dot_dimension_numbers<[1], [0], [0], [1], [0, 0, 1, 1], [], []>} : vector<16x6xf32>, vector<6x30xf32>, vector<16x30xf32> -> vector<16x30xf32>
    %232 = vector.extract_strided_slice %206 {offsets = [0, 18], sizes = [16, 6], strides = [1, 1]} : vector<16x90xf32> to vector<16x6xf32>
    %233 = vector.shape_cast %232 : vector<16x6xf32> to vector<2x8x6xf32>
    %234 = vector.extract_strided_slice %206 {offsets = [0, 24], sizes = [16, 6], strides = [1, 1]} : vector<16x90xf32> to vector<16x6xf32>
    %235 = vector.shape_cast %234 : vector<16x6xf32> to vector<2x8x6xf32>
    %236 = vector.extract_strided_slice %206 {offsets = [0, 30], sizes = [16, 6], strides = [1, 1]} : vector<16x90xf32> to vector<16x6xf32>
    %237 = vector.shape_cast %236 : vector<16x6xf32> to vector<2x8x6xf32>
    "tpu.trace_start"() <{level = 10 : i32, message = "bqe,bke->bqk"}> : () -> ()
    %cst_68 = arith.constant dense<0.000000e+00> : vector<2x8x8xf32>
    %238 = tpu.matmul %233, %235, %cst_68 {dimension_numbers = #tpu.dot_dimension_numbers<[2], [2], [1], [1], [0, 0, 0, 1, 1, 1], [0], [0]>} : vector<2x8x6xf32>, vector<2x8x6xf32>, vector<2x8x8xf32> -> vector<2x8x8xf32>
    "tpu.trace_stop"() : () -> ()
    %cst_69 = arith.constant dense<0xFF800000> : vector<2x8xf32>
    %239 = vector.multi_reduction <maximumf>, %238, %cst_69 [2] : vector<2x8x8xf32> to vector<2x8xf32>
    %240 = vector.shape_cast %239 : vector<2x8xf32> to vector<2x8x1xf32>
    %241 = vector.broadcast %240 : vector<2x8x1xf32> to vector<2x8x8xf32>
    %242 = arith.subf %238, %241 : vector<2x8x8xf32>
    %243 = math.exp %242 : vector<2x8x8xf32>
    %cst_70 = arith.constant dense<0.000000e+00> : vector<2x8xf32>
    %244 = vector.multi_reduction <add>, %243, %cst_70 [2] : vector<2x8x8xf32> to vector<2x8xf32>
    %245 = vector.shape_cast %244 : vector<2x8xf32> to vector<2x8x1xf32>
    %246 = tpu.reciprocal %245 {approx = true} : vector<2x8x1xf32> -> vector<2x8x1xf32>
    %247 = arith.mulf %245, %246 : vector<2x8x1xf32>
    %cst_71 = arith.constant 2.000000e+00 : f32
    %248 = vector.broadcast %cst_71 : f32 to vector<2x8x1xf32>
    %249 = arith.subf %248, %247 : vector<2x8x1xf32>
    %250 = arith.mulf %246, %249 : vector<2x8x1xf32>
    %251 = vector.broadcast %250 : vector<2x8x1xf32> to vector<2x8x8xf32>
    %252 = arith.mulf %243, %251 : vector<2x8x8xf32>
    "tpu.trace_start"() <{level = 10 : i32, message = "bqk,bke->bqe"}> : () -> ()
    %cst_72 = arith.constant dense<0.000000e+00> : vector<2x8x6xf32>
    %253 = tpu.matmul %252, %237, %cst_72 {dimension_numbers = #tpu.dot_dimension_numbers<[2], [1], [1], [2], [0, 0, 0, 1, 1, 2], [0], [0]>} : vector<2x8x8xf32>, vector<2x8x6xf32>, vector<2x8x6xf32> -> vector<2x8x6xf32>
    "tpu.trace_stop"() : () -> ()
    %c320 = arith.constant 320 : index
    %c0_73 = arith.constant 0 : index
    %254 = vector.load %arg1[%c320, %c0_73] : memref<528x128xf32, #tpu.memory_space<vmem>>, vector<6x30xf32>
    %255 = vector.shape_cast %253 : vector<2x8x6xf32> to vector<16x6xf32>
    %cst_74 = arith.constant dense<0.000000e+00> : vector<16x30xf32>
    %256 = tpu.matmul %255, %254, %cst_74 {dimension_numbers = #tpu.dot_dimension_numbers<[1], [0], [0], [1], [0, 0, 1, 1], [], []>} : vector<16x6xf32>, vector<6x30xf32>, vector<16x30xf32> -> vector<16x30xf32>
    %257 = arith.addf %231, %256 : vector<16x30xf32>
    %258 = vector.extract_strided_slice %206 {offsets = [0, 36], sizes = [16, 6], strides = [1, 1]} : vector<16x90xf32> to vector<16x6xf32>
    %259 = vector.shape_cast %258 : vector<16x6xf32> to vector<2x8x6xf32>
    %260 = vector.extract_strided_slice %206 {offsets = [0, 42], sizes = [16, 6], strides = [1, 1]} : vector<16x90xf32> to vector<16x6xf32>
    %261 = vector.shape_cast %260 : vector<16x6xf32> to vector<2x8x6xf32>
    %262 = vector.extract_strided_slice %206 {offsets = [0, 48], sizes = [16, 6], strides = [1, 1]} : vector<16x90xf32> to vector<16x6xf32>
    %263 = vector.shape_cast %262 : vector<16x6xf32> to vector<2x8x6xf32>
    "tpu.trace_start"() <{level = 10 : i32, message = "bqe,bke->bqk"}> : () -> ()
    %cst_75 = arith.constant dense<0.000000e+00> : vector<2x8x8xf32>
    %264 = tpu.matmul %259, %261, %cst_75 {dimension_numbers = #tpu.dot_dimension_numbers<[2], [2], [1], [1], [0, 0, 0, 1, 1, 1], [0], [0]>} : vector<2x8x6xf32>, vector<2x8x6xf32>, vector<2x8x8xf32> -> vector<2x8x8xf32>
    "tpu.trace_stop"() : () -> ()
    %cst_76 = arith.constant dense<0xFF800000> : vector<2x8xf32>
    %265 = vector.multi_reduction <maximumf>, %264, %cst_76 [2] : vector<2x8x8xf32> to vector<2x8xf32>
    %266 = vector.shape_cast %265 : vector<2x8xf32> to vector<2x8x1xf32>
    %267 = vector.broadcast %266 : vector<2x8x1xf32> to vector<2x8x8xf32>
    %268 = arith.subf %264, %267 : vector<2x8x8xf32>
    %269 = math.exp %268 : vector<2x8x8xf32>
    %cst_77 = arith.constant dense<0.000000e+00> : vector<2x8xf32>
    %270 = vector.multi_reduction <add>, %269, %cst_77 [2] : vector<2x8x8xf32> to vector<2x8xf32>
    %271 = vector.shape_cast %270 : vector<2x8xf32> to vector<2x8x1xf32>
    %272 = tpu.reciprocal %271 {approx = true} : vector<2x8x1xf32> -> vector<2x8x1xf32>
    %273 = arith.mulf %271, %272 : vector<2x8x1xf32>
    %cst_78 = arith.constant 2.000000e+00 : f32
    %274 = vector.broadcast %cst_78 : f32 to vector<2x8x1xf32>
    %275 = arith.subf %274, %273 : vector<2x8x1xf32>
    %276 = arith.mulf %272, %275 : vector<2x8x1xf32>
    %277 = vector.broadcast %276 : vector<2x8x1xf32> to vector<2x8x8xf32>
    %278 = arith.mulf %269, %277 : vector<2x8x8xf32>
    "tpu.trace_start"() <{level = 10 : i32, message = "bqk,bke->bqe"}> : () -> ()
    %cst_79 = arith.constant dense<0.000000e+00> : vector<2x8x6xf32>
    %279 = tpu.matmul %278, %263, %cst_79 {dimension_numbers = #tpu.dot_dimension_numbers<[2], [1], [1], [2], [0, 0, 0, 1, 1, 2], [0], [0]>} : vector<2x8x8xf32>, vector<2x8x6xf32>, vector<2x8x6xf32> -> vector<2x8x6xf32>
    "tpu.trace_stop"() : () -> ()
    %c328 = arith.constant 328 : index
    %c0_80 = arith.constant 0 : index
    %280 = vector.load %arg1[%c328, %c0_80] : memref<528x128xf32, #tpu.memory_space<vmem>>, vector<6x30xf32>
    %281 = vector.shape_cast %279 : vector<2x8x6xf32> to vector<16x6xf32>
    %cst_81 = arith.constant dense<0.000000e+00> : vector<16x30xf32>
    %282 = tpu.matmul %281, %280, %cst_81 {dimension_numbers = #tpu.dot_dimension_numbers<[1], [0], [0], [1], [0, 0, 1, 1], [], []>} : vector<16x6xf32>, vector<6x30xf32>, vector<16x30xf32> -> vector<16x30xf32>
    %283 = arith.addf %257, %282 : vector<16x30xf32>
    %284 = vector.extract_strided_slice %206 {offsets = [0, 54], sizes = [16, 6], strides = [1, 1]} : vector<16x90xf32> to vector<16x6xf32>
    %285 = vector.shape_cast %284 : vector<16x6xf32> to vector<2x8x6xf32>
    %286 = vector.extract_strided_slice %206 {offsets = [0, 60], sizes = [16, 6], strides = [1, 1]} : vector<16x90xf32> to vector<16x6xf32>
    %287 = vector.shape_cast %286 : vector<16x6xf32> to vector<2x8x6xf32>
    %288 = vector.extract_strided_slice %206 {offsets = [0, 66], sizes = [16, 6], strides = [1, 1]} : vector<16x90xf32> to vector<16x6xf32>
    %289 = vector.shape_cast %288 : vector<16x6xf32> to vector<2x8x6xf32>
    "tpu.trace_start"() <{level = 10 : i32, message = "bqe,bke->bqk"}> : () -> ()
    %cst_82 = arith.constant dense<0.000000e+00> : vector<2x8x8xf32>
    %290 = tpu.matmul %285, %287, %cst_82 {dimension_numbers = #tpu.dot_dimension_numbers<[2], [2], [1], [1], [0, 0, 0, 1, 1, 1], [0], [0]>} : vector<2x8x6xf32>, vector<2x8x6xf32>, vector<2x8x8xf32> -> vector<2x8x8xf32>
    "tpu.trace_stop"() : () -> ()
    %cst_83 = arith.constant dense<0xFF800000> : vector<2x8xf32>
    %291 = vector.multi_reduction <maximumf>, %290, %cst_83 [2] : vector<2x8x8xf32> to vector<2x8xf32>
    %292 = vector.shape_cast %291 : vector<2x8xf32> to vector<2x8x1xf32>
    %293 = vector.broadcast %292 : vector<2x8x1xf32> to vector<2x8x8xf32>
    %294 = arith.subf %290, %293 : vector<2x8x8xf32>
    %295 = math.exp %294 : vector<2x8x8xf32>
    %cst_84 = arith.constant dense<0.000000e+00> : vector<2x8xf32>
    %296 = vector.multi_reduction <add>, %295, %cst_84 [2] : vector<2x8x8xf32> to vector<2x8xf32>
    %297 = vector.shape_cast %296 : vector<2x8xf32> to vector<2x8x1xf32>
    %298 = tpu.reciprocal %297 {approx = true} : vector<2x8x1xf32> -> vector<2x8x1xf32>
    %299 = arith.mulf %297, %298 : vector<2x8x1xf32>
    %cst_85 = arith.constant 2.000000e+00 : f32
    %300 = vector.broadcast %cst_85 : f32 to vector<2x8x1xf32>
    %301 = arith.subf %300, %299 : vector<2x8x1xf32>
    %302 = arith.mulf %298, %301 : vector<2x8x1xf32>
    %303 = vector.broadcast %302 : vector<2x8x1xf32> to vector<2x8x8xf32>
    %304 = arith.mulf %295, %303 : vector<2x8x8xf32>
    "tpu.trace_start"() <{level = 10 : i32, message = "bqk,bke->bqe"}> : () -> ()
    %cst_86 = arith.constant dense<0.000000e+00> : vector<2x8x6xf32>
    %305 = tpu.matmul %304, %289, %cst_86 {dimension_numbers = #tpu.dot_dimension_numbers<[2], [1], [1], [2], [0, 0, 0, 1, 1, 2], [0], [0]>} : vector<2x8x8xf32>, vector<2x8x6xf32>, vector<2x8x6xf32> -> vector<2x8x6xf32>
    "tpu.trace_stop"() : () -> ()
    %c336 = arith.constant 336 : index
    %c0_87 = arith.constant 0 : index
    %306 = vector.load %arg1[%c336, %c0_87] : memref<528x128xf32, #tpu.memory_space<vmem>>, vector<6x30xf32>
    %307 = vector.shape_cast %305 : vector<2x8x6xf32> to vector<16x6xf32>
    %cst_88 = arith.constant dense<0.000000e+00> : vector<16x30xf32>
    %308 = tpu.matmul %307, %306, %cst_88 {dimension_numbers = #tpu.dot_dimension_numbers<[1], [0], [0], [1], [0, 0, 1, 1], [], []>} : vector<16x6xf32>, vector<6x30xf32>, vector<16x30xf32> -> vector<16x30xf32>
    %309 = arith.addf %283, %308 : vector<16x30xf32>
    %310 = vector.extract_strided_slice %206 {offsets = [0, 72], sizes = [16, 6], strides = [1, 1]} : vector<16x90xf32> to vector<16x6xf32>
    %311 = vector.shape_cast %310 : vector<16x6xf32> to vector<2x8x6xf32>
    %312 = vector.extract_strided_slice %206 {offsets = [0, 78], sizes = [16, 6], strides = [1, 1]} : vector<16x90xf32> to vector<16x6xf32>
    %313 = vector.shape_cast %312 : vector<16x6xf32> to vector<2x8x6xf32>
    %314 = vector.extract_strided_slice %206 {offsets = [0, 84], sizes = [16, 6], strides = [1, 1]} : vector<16x90xf32> to vector<16x6xf32>
    %315 = vector.shape_cast %314 : vector<16x6xf32> to vector<2x8x6xf32>
    "tpu.trace_start"() <{level = 10 : i32, message = "bqe,bke->bqk"}> : () -> ()
    %cst_89 = arith.constant dense<0.000000e+00> : vector<2x8x8xf32>
    %316 = tpu.matmul %311, %313, %cst_89 {dimension_numbers = #tpu.dot_dimension_numbers<[2], [2], [1], [1], [0, 0, 0, 1, 1, 1], [0], [0]>} : vector<2x8x6xf32>, vector<2x8x6xf32>, vector<2x8x8xf32> -> vector<2x8x8xf32>
    "tpu.trace_stop"() : () -> ()
    %cst_90 = arith.constant dense<0xFF800000> : vector<2x8xf32>
    %317 = vector.multi_reduction <maximumf>, %316, %cst_90 [2] : vector<2x8x8xf32> to vector<2x8xf32>
    %318 = vector.shape_cast %317 : vector<2x8xf32> to vector<2x8x1xf32>
    %319 = vector.broadcast %318 : vector<2x8x1xf32> to vector<2x8x8xf32>
    %320 = arith.subf %316, %319 : vector<2x8x8xf32>
    %321 = math.exp %320 : vector<2x8x8xf32>
    %cst_91 = arith.constant dense<0.000000e+00> : vector<2x8xf32>
    %322 = vector.multi_reduction <add>, %321, %cst_91 [2] : vector<2x8x8xf32> to vector<2x8xf32>
    %323 = vector.shape_cast %322 : vector<2x8xf32> to vector<2x8x1xf32>
    %324 = tpu.reciprocal %323 {approx = true} : vector<2x8x1xf32> -> vector<2x8x1xf32>
    %325 = arith.mulf %323, %324 : vector<2x8x1xf32>
    %cst_92 = arith.constant 2.000000e+00 : f32
    %326 = vector.broadcast %cst_92 : f32 to vector<2x8x1xf32>
    %327 = arith.subf %326, %325 : vector<2x8x1xf32>
    %328 = arith.mulf %324, %327 : vector<2x8x1xf32>
    %329 = vector.broadcast %328 : vector<2x8x1xf32> to vector<2x8x8xf32>
    %330 = arith.mulf %321, %329 : vector<2x8x8xf32>
    "tpu.trace_start"() <{level = 10 : i32, message = "bqk,bke->bqe"}> : () -> ()
    %cst_93 = arith.constant dense<0.000000e+00> : vector<2x8x6xf32>
    %331 = tpu.matmul %330, %315, %cst_93 {dimension_numbers = #tpu.dot_dimension_numbers<[2], [1], [1], [2], [0, 0, 0, 1, 1, 2], [0], [0]>} : vector<2x8x8xf32>, vector<2x8x6xf32>, vector<2x8x6xf32> -> vector<2x8x6xf32>
    "tpu.trace_stop"() : () -> ()
    %c344 = arith.constant 344 : index
    %c0_94 = arith.constant 0 : index
    %332 = vector.load %arg1[%c344, %c0_94] : memref<528x128xf32, #tpu.memory_space<vmem>>, vector<6x30xf32>
    %333 = vector.shape_cast %331 : vector<2x8x6xf32> to vector<16x6xf32>
    %cst_95 = arith.constant dense<0.000000e+00> : vector<16x30xf32>
    %334 = tpu.matmul %333, %332, %cst_95 {dimension_numbers = #tpu.dot_dimension_numbers<[1], [0], [0], [1], [0, 0, 1, 1], [], []>} : vector<16x6xf32>, vector<6x30xf32>, vector<16x30xf32> -> vector<16x30xf32>
    %335 = arith.addf %309, %334 : vector<16x30xf32>
    %c520 = arith.constant 520 : index
    %c0_96 = arith.constant 0 : index
    %336 = vector.load %arg1[%c520, %c0_96] : memref<528x128xf32, #tpu.memory_space<vmem>>, vector<6x30xf32>
    %337 = vector.extract_strided_slice %336 {offsets = [0, 0], sizes = [1, 30], strides = [1, 1]} : vector<6x30xf32> to vector<1x30xf32>
    %338 = vector.broadcast %337 : vector<1x30xf32> to vector<16x30xf32>
    %339 = arith.addf %335, %338 : vector<16x30xf32>
    %340 = arith.addf %201, %339 : vector<16x30xf32>
    %341 = vector.extract_strided_slice %336 {offsets = [1, 0], sizes = [1, 30], strides = [1, 1]} : vector<6x30xf32> to vector<1x30xf32>
    %342 = vector.extract_strided_slice %336 {offsets = [2, 0], sizes = [1, 30], strides = [1, 1]} : vector<6x30xf32> to vector<1x30xf32>
    %cst_97 = arith.constant dense<0.000000e+00> : vector<16xf32>
    %343 = vector.multi_reduction <add>, %340, %cst_97 [1] : vector<16x30xf32> to vector<16xf32>
    %344 = vector.shape_cast %343 : vector<16xf32> to vector<16x1xf32>
    %cst_98 = arith.constant 3.000000e+01 : f32
    %345 = vector.broadcast %cst_98 : f32 to vector<16x1xf32>
    %346 = arith.divf %344, %345 : vector<16x1xf32>
    %347 = vector.broadcast %346 : vector<16x1xf32> to vector<16x30xf32>
    %348 = arith.subf %340, %347 : vector<16x30xf32>
    %349 = arith.mulf %348, %348 : vector<16x30xf32>
    %cst_99 = arith.constant dense<0.000000e+00> : vector<16xf32>
    %350 = vector.multi_reduction <add>, %349, %cst_99 [1] : vector<16x30xf32> to vector<16xf32>
    %351 = vector.shape_cast %350 : vector<16xf32> to vector<16x1xf32>
    %cst_100 = arith.constant 3.000000e+01 : f32
    %352 = vector.broadcast %cst_100 : f32 to vector<16x1xf32>
    %353 = arith.divf %351, %352 : vector<16x1xf32>
    %cst_101 = arith.constant 9.99999974E-6 : f32
    %354 = vector.broadcast %cst_101 : f32 to vector<16x1xf32>
    %355 = arith.addf %353, %354 : vector<16x1xf32>
    %356 = math.rsqrt %355 : vector<16x1xf32>
    %357 = vector.broadcast %356 : vector<16x1xf32> to vector<16x30xf32>
    %358 = arith.mulf %348, %357 : vector<16x30xf32>
    %359 = vector.broadcast %341 : vector<1x30xf32> to vector<16x30xf32>
    %360 = arith.mulf %358, %359 : vector<16x30xf32>
    %361 = vector.broadcast %342 : vector<1x30xf32> to vector<16x30xf32>
    %362 = arith.addf %360, %361 : vector<16x30xf32>
    %c352 = arith.constant 352 : index
    %c0_102 = arith.constant 0 : index
    %363 = vector.load %arg1[%c352, %c0_102] : memref<528x128xf32, #tpu.memory_space<vmem>>, vector<30x128xf32>
    %c384 = arith.constant 384 : index
    %c0_103 = arith.constant 0 : index
    %364 = vector.load %arg1[%c384, %c0_103] : memref<528x128xf32, #tpu.memory_space<vmem>>, vector<1x128xf32>
    %cst_104 = arith.constant dense<0.000000e+00> : vector<16x128xf32>
    %365 = tpu.matmul %362, %363, %cst_104 {dimension_numbers = #tpu.dot_dimension_numbers<[1], [0], [0], [1], [0, 0, 1, 1], [], []>} : vector<16x30xf32>, vector<30x128xf32>, vector<16x128xf32> -> vector<16x128xf32>
    %366 = vector.broadcast %364 : vector<1x128xf32> to vector<16x128xf32>
    %367 = arith.addf %365, %366 : vector<16x128xf32>
    %cst_105 = arith.constant 0.000000e+00 : f32
    %368 = vector.broadcast %cst_105 : f32 to vector<16x128xf32>
    %369 = arith.maximumf %367, %368 : vector<16x128xf32>
    %c392 = arith.constant 392 : index
    %c0_106 = arith.constant 0 : index
    %370 = vector.load %arg1[%c392, %c0_106] : memref<528x128xf32, #tpu.memory_space<vmem>>, vector<128x30xf32>
    %cst_107 = arith.constant dense<0.000000e+00> : vector<16x30xf32>
    %371 = tpu.matmul %369, %370, %cst_107 {dimension_numbers = #tpu.dot_dimension_numbers<[1], [0], [0], [1], [0, 0, 1, 1], [], []>} : vector<16x128xf32>, vector<128x30xf32>, vector<16x30xf32> -> vector<16x30xf32>
    %372 = vector.extract_strided_slice %336 {offsets = [3, 0], sizes = [1, 30], strides = [1, 1]} : vector<6x30xf32> to vector<1x30xf32>
    %373 = vector.broadcast %372 : vector<1x30xf32> to vector<16x30xf32>
    %374 = arith.addf %371, %373 : vector<16x30xf32>
    %375 = arith.addf %362, %374 : vector<16x30xf32>
    %376 = vector.extract_strided_slice %336 {offsets = [4, 0], sizes = [1, 30], strides = [1, 1]} : vector<6x30xf32> to vector<1x30xf32>
    %377 = vector.extract_strided_slice %336 {offsets = [5, 0], sizes = [1, 30], strides = [1, 1]} : vector<6x30xf32> to vector<1x30xf32>
    %cst_108 = arith.constant dense<0.000000e+00> : vector<16xf32>
    %378 = vector.multi_reduction <add>, %375, %cst_108 [1] : vector<16x30xf32> to vector<16xf32>
    %379 = vector.shape_cast %378 : vector<16xf32> to vector<16x1xf32>
    %cst_109 = arith.constant 3.000000e+01 : f32
    %380 = vector.broadcast %cst_109 : f32 to vector<16x1xf32>
    %381 = arith.divf %379, %380 : vector<16x1xf32>
    %382 = vector.broadcast %381 : vector<16x1xf32> to vector<16x30xf32>
    %383 = arith.subf %375, %382 : vector<16x30xf32>
    %384 = arith.mulf %383, %383 : vector<16x30xf32>
    %cst_110 = arith.constant dense<0.000000e+00> : vector<16xf32>
    %385 = vector.multi_reduction <add>, %384, %cst_110 [1] : vector<16x30xf32> to vector<16xf32>
    %386 = vector.shape_cast %385 : vector<16xf32> to vector<16x1xf32>
    %cst_111 = arith.constant 3.000000e+01 : f32
    %387 = vector.broadcast %cst_111 : f32 to vector<16x1xf32>
    %388 = arith.divf %386, %387 : vector<16x1xf32>
    %cst_112 = arith.constant 9.99999974E-6 : f32
    %389 = vector.broadcast %cst_112 : f32 to vector<16x1xf32>
    %390 = arith.addf %388, %389 : vector<16x1xf32>
    %391 = math.rsqrt %390 : vector<16x1xf32>
    %392 = vector.broadcast %391 : vector<16x1xf32> to vector<16x30xf32>
    %393 = arith.mulf %383, %392 : vector<16x30xf32>
    %394 = vector.broadcast %376 : vector<1x30xf32> to vector<16x30xf32>
    %395 = arith.mulf %393, %394 : vector<16x30xf32>
    %396 = vector.broadcast %377 : vector<1x30xf32> to vector<16x30xf32>
    %397 = arith.addf %395, %396 : vector<16x30xf32>
    %398 = vector.shape_cast %397 : vector<16x30xf32> to vector<2x8x30xf32>
    %399 = vector.extract_strided_slice %398 {offsets = [0, 7, 0], sizes = [2, 1, 30], strides = [1, 1, 1]} : vector<2x8x30xf32> to vector<2x1x30xf32>
    %400 = vector.shape_cast %399 : vector<2x1x30xf32> to vector<2x30xf32>
    %c8 = arith.constant 8 : index
    %c0_113 = arith.constant 0 : index
    %401 = vector.load %arg1[%c8, %c0_113] : memref<528x128xf32, #tpu.memory_space<vmem>>, vector<3x30xf32>
    %c11 = arith.constant 11 : index
    %c0_114 = arith.constant 0 : index
    %402 = vector.load %arg1[%c11, %c0_114] : memref<528x128xf32, #tpu.memory_space<vmem>>, vector<1x3xf32>
    "tpu.trace_start"() <{level = 10 : i32, message = "bd,sd->bs"}> : () -> ()
    %cst_115 = arith.constant dense<0.000000e+00> : vector<2x3xf32>
    %403 = tpu.matmul %400, %401, %cst_115 {dimension_numbers = #tpu.dot_dimension_numbers<[1], [1], [0], [0], [0, 0, 1, 0], [], []>} : vector<2x30xf32>, vector<3x30xf32>, vector<2x3xf32> -> vector<2x3xf32>
    "tpu.trace_stop"() : () -> ()
    %404 = vector.broadcast %402 : vector<1x3xf32> to vector<2x3xf32>
    %405 = arith.addf %403, %404 : vector<2x3xf32>
    %c0_116 = arith.constant 0 : index
    %c0_117 = arith.constant 0 : index
    %406 = vector.load %arg2[%c0_116, %c0_117] : memref<2x3xf32, #tpu.memory_space<vmem>>, vector<2x3xf32>
    tpu.vector_store %arg2[%c0_116, %c0_117], %405 {strides = array<i32>} : memref<2x3xf32, #tpu.memory_space<vmem>>, vector<2x3xf32>,
    return
  }
}

</mosaic_0001>

<bundles_post_ra>
// kernel: tpu_custom_call.1
= control target key start
LH: loop header
LB: loop body
LE: loop exit
PB: predicated region body
PF: predicated region fallthrough
CT: control target
= control target key end

     0   :  { %7 = vsyncpa [#allocation3], 0  ;;  %s6666_s0 = inlined_call_operand.hbm [shape: f32[2,8,30], index: 0, kind: input, shape index: {}]   ;;  %s6667_s1 = inlined_call_operand.hbm [shape: f32[528,128], index: 1, kind: input, shape index: {}]   ;;  %s6668_s2 = inlined_call_operand.hbm [shape: f32[2,3], index: 2, kind: output, shape index: {}]  }
   0x1   :  { %8 = vsyncpa [#allocation6], 0 }
   0x2   :  { %9 = vsyncpa [#allocation4], 0  ;;  %s6073_s9 = smov [#allocation2]   ;;  %s6001_s13 = scalar_lea.hbm %s6666_s0, 256 }
   0x3   :  { %s15_s10 = sshll.u32 %s6073_s9, 4  ;;  %p6002_p0 = scmp.ne.s32.totalorder %s6666_s0, %s6001_s13  ;;  %s16_s10 = int_to_ptr.vmem [resolvable:$true] %s15_s10 }
   0x4   :  { %p6005_p1 = scmp.lt.u32.totalorder %s6001_s13, %s6666_s0 }
   0x6   :  { %p6007_p2 = pnand %p6005_p1, %p6002_p0 }
   0x8   :  { %6010 = shalt.err (!%p6007_p2)
}
   0x9   :  { %s6011_s18 = scalar_lea.vmem %s16_s10, 256  ;;  %p6016_p4 = scmp.lt.s32.totalorder %s16_s10, %s16_s10 }
   0xa   :  { %p6012_p3 = scmp.ne.s32.totalorder %s16_s10, %s6011_s18  ;;  %p6017_p5 = scmp.lt.s32.totalorder %s6011_s18, %s6011_s18 }
   0xc   :  { %p6018_p6 = por %p6017_p5, %p6016_p4 }
   0xe   :  { %p6019_p7 = pnand %p6018_p6, %p6012_p3 }
  0x10   :  { %6022 = shalt.err (!%p6019_p7)
}
  0x11   :  { %s6074_s19 = smov 128   ;;  %s6075_s20 = smov 8  }
  0x12   :  { %21 = dma.hbm_to_vmem [thread:$0]  %s6666_s0, 256, %s16_s10, [#allocation3], %s6074_s19, %s6074_s19, %s6075_s20  }
  0x13   :  { %s6076_s23 = smov [#allocation5]   ;;  %s6023_s27 = scalar_lea.hbm %s6667_s1, 8448 }
  0x14   :  { %s27_s24 = sshll.u32 %s6076_s23, 4  ;;  %p6024_p8 = scmp.ne.s32.totalorder %s6667_s1, %s6023_s27  ;;  %s28_s24 = int_to_ptr.vmem [resolvable:$true] %s27_s24 }
  0x15   :  { %p6027_p9 = scmp.lt.u32.totalorder %s6023_s27, %s6667_s1 }
  0x17   :  { %p6029_p10 = pnand %p6027_p9, %p6024_p8 }
  0x19   :  { %6032 = shalt.err (!%p6029_p10)
}
  0x1a   :  { %s6033_s4 = scalar_lea.vmem %s28_s24, 8448  ;;  %p6038_p12 = scmp.lt.s32.totalorder %s28_s24, %s28_s24 }
  0x1b   :  { %p6034_p11 = scmp.ne.s32.totalorder %s28_s24, %s6033_s4  ;;  %p6039_p13 = scmp.lt.s32.totalorder %s6033_s4, %s6033_s4 }
  0x1d   :  { %p6040_p0 = por %p6039_p13, %p6038_p12 }
  0x1f   :  { %p6041_p1 = pnand %p6040_p0, %p6034_p11 }
  0x21   :  { %6044 = shalt.err (!%p6041_p1)
}
  0x22   :  { %33 = dma.hbm_to_vmem [thread:$0]  %s6667_s1, 8448, %s28_s24, [#allocation6], %s6074_s19, %s6074_s19, %s6075_s20  }
  0x23   :  { %6067 = dma.done.wait [#allocation3], 256  }
  0x24   :  { %6068 = vsyncadd [#allocation3], 4294967040 }
  0x25   :  { %6069 = dma.done.wait [#allocation6], 8448  }
  0x26   :  { %6070 = vsyncadd [#allocation6], 4294958848  ;;  %vm61_vm0 = vcmask 1045504   ;;  %v45_v0 = vld [vmem:[#allocation5 + $0x10] sm:$0xff]  ;;  %v46_v1 = vld [vmem:[#allocation5 + $0x18] sm:$0xff]  ;;  %vm54_vm1 = vcmask 244736  }
  0x27   :  { %v47_v2 = vld [vmem:[#allocation5 + $0x20] sm:$0xff]  ;;  %v5763_v3 = vpack.c.bf16 %v46_v1, %v45_v0  ;;  %v48_v4 = vld [vmem:[#allocation5 + $0x28] sm:$0x3f]  ;;  %v41_v6 = vld [vmem:[#allocation2] sm:$0xff]  ;;  %vm6077_vm2 = vmmov 1   ;;  %v6078_v12 = vmov 0.0  }
  0x28   :  { %v40_v5 = vld [vmem:[#allocation5] sm:$0xff]  ;;  %v5767_v7 = vpack.c.bf16 %v48_v4, %v47_v2  ;;  %vm6135_vm3 = vmpackc.low %vm61_vm0, %vm6077_vm2  ;;  %v42_v10 = vld [vmem:[#allocation2 + $0x8] sm:$0xff]  ;;  %5405 = vmatprep.subr.mxu1 %v6078_v12  ;;  %vm6079_vm4 = vmmov 0   ;;  %s6080_s1 = smov 122   ;;  %s6081_s6 = smov 116   ;;  %vm143_vm5 = vcmask 48128  }
  0x29   :  { %v6139_v9 = vadd.f32 %v41_v6, %v40_v5  ;;  %5764 = vmatprep.subr.bf16.mxu0 %v5763_v3  ;;  %v6145_v11 = vadd.f32 %v42_v10, %v40_v5  ;;  %5407 = vmatprep.mubr.msk.f32.mxu1 %vm6079_vm4, %v6078_v12  ;;  %v5113_v13 = vld [vmem:[#allocation5 + $0x30] ss:$0 sm:$0xff]  ;;  %s6082_s7 = smov 110   ;;  %vm295_vm6 = vcmask 64512   ;;  %s6083_s8 = smov 104   ;;  %vm5018_vm7 = vcmask 1041409  }
  0x2a   :  { %5766 = vmatpush3.bf16.msra.mxu0 %v5763_v3  ;;  %s6084_s9 = smov 98   ;;  %s6085_s10 = smov 92   ;;  %vm5095_vm8 = vcmask 17408  }
  0x2b   :  { %5402 = vmatprep.mubr.msk.f32.mxu0 %vm54_vm1, %v6139_v9  ;;  %5769 = vmatprep.subr.msk.bf16.mxu0 %vm6135_vm3, %v5767_v7  ;;  %s6086_s11 = smov 86   ;;  %s6087_s12 = smov 80  }
  0x2c   :  { %s6088_s13 = smov 68   ;;  %s6089_s14 = smov 74  }
  0x2d   :  { %s6090_s15 = smov 50   ;;  %s6091_s16 = smov 56  }
  0x2e   :  { %5772 = vmatpush3.bf16.msk.msra.mxu0 %vm6135_vm3, %v5767_v7  ;;  %s6092_s17 = smov 62   ;;  %s6093_s18 = smov 44  }
  0x2f   :  { %5415 = vmatprep.subr.mxu0 %v6078_v12  ;;  %s6094_s19 = smov [#allocation7]  }
  0x30   :  { %s5103_s20 = sshll.u32 %s6094_s19, 4  ;;  %s5104_s20 = int_to_ptr.vmem [resolvable:$true] %s5103_s20 }
  0x31   :  { %5403 = vmatmul.mubr.msk.f32.vlgmr.msra.gmra.mrb[0].mxu0 %vm54_vm1, %v6145_v11  ;;  %s6045_s21 = scalar_lea.vmem %s5104_s20, 32  ;;  %p6050_p3 = scmp.lt.s32.totalorder %s5104_s20, %s5104_s20 }
  0x32   :  { %5417 = vmatprep.mubr.msk.f32.mxu0 %vm6079_vm4, %v6078_v12  ;;  %p6046_p2 = scmp.ne.s32.totalorder %s5104_s20, %s6045_s21  ;;  %p6051_p4 = scmp.lt.s32.totalorder %s6045_s21, %s6045_s21 }
  0x34   :  { %p6052_p5 = por %p6051_p4, %p6050_p3 }
  0x36   :  { %p6053_p6 = pnand %p6052_p5, %p6046_p2 }
 0x104   :  { %v5404_v14 = vpop.f32.mrb[0].mxu0 }
 0x105   :  { %v131_v15 = vpop.f32.mrb[1].mxu0  ;;  %v6161_v17 = vadd.f32 %v5404_v14, %v5113_v13 }
 0x106   :  { %v6157_v16 = vadd.f32 %v5113_v13, %v131_v15 }
 0x108   :  { %141 = vrot.lane.b32.xlu0 %v6157_v16, %s6080_s1 }
 0x10c   :  { %219 = vrot.lane.b32.xlu0 %v6161_v17, %s6080_s1 }
 0x110   :  { %400 = vrot.lane.b32.xlu0 %v6161_v17, %s6081_s6 }
 0x114   :  { %555 = vrot.lane.b32.xlu0 %v6161_v17, %s6082_s7 }
 0x17a   :  { %v142_v18 = vpop.permute.xlu0 %141 }
 0x17b   :  { %5406 = vmatpush3.xpose.msk.msra.mxu1 %vm143_vm5, %v142_v18 }
 0x17c   :  { %5410 = vmatprep.subr.mxu1 %v6078_v12 }
 0x17e   :  { %5408 = vmatmul.mubr.msk.f32.vlgmr.msra.gmra.mrb[0].mxu1 %vm143_vm5, %v6157_v16  ;;  %v220_v19 = vpop.permute.xlu0 %219 }
 0x17f   :  { %5411 = vmatpush3.xpose.msk.msra.mxu1 %vm143_vm5, %v220_v19  ;;  %5412 = vmatprep.mubr.msk.f32.mxu1 %vm6079_vm4, %v6078_v12 }
 0x180   :  { %5420 = vmatprep.subr.mxu1 %v6078_v12 }
 0x182   :  { %5413 = vmatmul.mubr.msk.f32.vlgmr.msra.gmra.mrb[2].mxu1 %vm143_vm5, %v6161_v17  ;;  %v401_v20 = vpop.permute.xlu0 %400 }
 0x183   :  { %5421 = vmatpush3.msra.mxu1 %v401_v20  ;;  %5422 = vmatprep.mubr.msk.f32.mxu1 %vm6079_vm4, %v6078_v12 }
 0x184   :  { %5430 = vmatprep.subr.mxu1 %v6078_v12 }
 0x186   :  { %v556_v27 = vpop.permute.xlu0 %555 }
 0x251   :  { %v214_v21 = vpop.f32.mrb[0].mxu1 }
 0x252   :  { %v5409_v22 = vpop.f32.mrb[1].mxu1  ;;  %v296_v23 = vsel %vm295_vm6, %v214_v21, -inf }
 0x253   :  { %297 = vmax.xlane.f32.xlu0 %v296_v23 }
 0x255   :  { %v291_v24 = vpop.f32.mrb[2].mxu1 }
 0x256   :  { %v5414_v25 = vpop.f32.mrb[3].mxu1  ;;  %v299_v26 = vsel %vm295_vm6, %v291_v24, -inf }
 0x257   :  { %300 = vmax.xlane.f32.xlu1 %v299_v26 }
 0x269   :  { %324 = vrot.lane.b32.xlu0 %v6157_v16, %s6081_s6 }
 0x26d   :  { %477 = vrot.lane.b32.xlu0 %v6157_v16, %s6082_s7 }
 0x2e0   :  { %v298_v28 = vpop.xlane.xlu0 %297 }
 0x2e1   :  { %v302_v35 = vsub.f32 %v214_v21, %v298_v28 }
 0x2e3   :  { %v304_v36 = vmul.f32 1.442695, %v302_v35  ;;  %v476_v35 = vld [vmem:[#allocation5 + $0x38] sm:$0x3f] }
 0x2e4   :  { %v301_v29 = vpop.xlane.xlu1 %300  ;;  %v325_v30 = vpop.permute.xlu0 %324 }
 0x2e5   :  { %v303_v31 = vsub.f32 %v291_v24, %v301_v29  ;;  %5416 = vmatpush3.msra.mxu0 %v325_v30 }
 0x2e6   :  { %5425 = vmatprep.subr.mxu0 %v6078_v12 }
 0x2e7   :  { %v306_v32 = vmul.f32 1.442695, %v303_v31 }
 0x2e8   :  { %v478_v53 = vpop.permute.xlu0 %477 }
 0x2e9   :  { %5905 = vpow2.f32 %v306_v32 }
 0x2ea   :  { %5907 = vpow2.f32 %v304_v36 }
 0x2f3   :  { %v5906_v33 = vpop.eup %5905 }
 0x2f4   :  { %v311_v34 = vsel %vm295_vm6, %v5906_v33, 0.0  ;;  %v5908_v37 = vpop.eup %5907 }
 0x2f5   :  { %312 = vadd.xlane.f32.xlu1 %v311_v34  ;;  %v308_v38 = vsel %vm295_vm6, %v5908_v37, 0.0  ;;  %v813_v34 = vld [vmem:[#allocation5 + $0x40] sm:$0x3f] }
 0x306   :  { %557 = vrot.lane.b32.xlu1 %v6161_v17, %s6083_s8 }
 0x32a   :  { %309 = vadd.xlane.f32.xlu1 %v308_v38 }
 0x33b   :  { %479 = vrot.lane.b32.xlu1 %v6157_v16, %s6083_s8 }
 0x382   :  { %v313_v39 = vpop.xlane.xlu1 %312 }
 0x383   :  { %5909 = vrcp.f32 %v313_v39 }
 0x386   :  { %v558_v45 = vpop.permute.xlu1 %557 }
 0x38d   :  { %v5910_v40 = vpop.eup %5909 }
 0x38e   :  { %v317_v41 = vmul.f32 %v5910_v40, %v313_v39 }
 0x390   :  { %v319_v42 = vsub.f32 2.0, %v317_v41 }
 0x392   :  { %v321_v43 = vmul.f32 %v5910_v40, %v319_v42 }
 0x394   :  { %v323_v44 = vmul.f32 %v5906_v33, %v321_v43 }
 0x396   :  { %5423 = vmatmul.mubr.msk.f32.vlgmr.msra.gmra.mrb[4].mxu1 %vm295_vm6, %v323_v44 }
 0x397   :  { %5431 = vmatpush3.xpose.msk.msra.mxu1 %vm143_vm5, %v558_v45  ;;  %5432 = vmatprep.mubr.msk.f32.mxu1 %vm6079_vm4, %v6078_v12 }
 0x398   :  { %5440 = vmatprep.subr.mxu1 %v6078_v12 }
 0x39a   :  { %5433 = vmatmul.mubr.msk.f32.vlgmr.msra.gmra.mrb[6].mxu1 %vm143_vm5, %v556_v27 }
 0x39b   :  { %5442 = vmatprep.mubr.msk.f32.mxu1 %vm6079_vm4, %v6078_v12 }
 0x3b7   :  { %v310_v46 = vpop.xlane.xlu1 %309 }
 0x3b8   :  { %5911 = vrcp.f32 %v310_v46 }
 0x3bb   :  { %v480_v52 = vpop.permute.xlu1 %479 }
 0x3c2   :  { %v5912_v47 = vpop.eup %5911 }
 0x3c3   :  { %v316_v48 = vmul.f32 %v5912_v47, %v310_v46 }
 0x3c5   :  { %v318_v49 = vsub.f32 2.0, %v316_v48 }
 0x3c7   :  { %v320_v50 = vmul.f32 %v5912_v47, %v318_v49 }
 0x3c9   :  { %v322_v51 = vmul.f32 %v5908_v37, %v320_v50 }
 0x3cb   :  { %5418 = vmatmul.mubr.msk.f32.vlgmr.msra.gmra.mrb[2].mxu0 %vm295_vm6, %v322_v51 }
 0x3cc   :  { %5426 = vmatpush3.xpose.msk.msra.mxu0 %vm143_vm5, %v480_v52  ;;  %5427 = vmatprep.mubr.msk.f32.mxu0 %vm6079_vm4, %v6078_v12 }
 0x3cd   :  { %5435 = vmatprep.subr.mxu0 %v6078_v12 }
 0x3cf   :  { %5428 = vmatmul.mubr.msk.f32.vlgmr.msra.gmra.mrb[4].mxu0 %vm143_vm5, %v478_v53 }
 0x3d0   :  { %5437 = vmatprep.mubr.msk.f32.mxu0 %vm6079_vm4, %v6078_v12 }
 0x469   :  { %v6211_v54 = vpop.f32.mrb[4].mxu1 }
 0x46a   :  { %v5424_v55 = vpop.f32.mrb[5].mxu1 }
 0x46d   :  { %v629_v56 = vpop.f32.mrb[6].mxu1 }
 0x46e   :  { %v5434_v57 = vpop.f32.mrb[7].mxu1  ;;  %v636_v58 = vsel %vm295_vm6, %v629_v56, -inf }
 0x46f   :  { %637 = vmax.xlane.f32.xlu0 %v636_v58 }
 0x485   :  { %737 = vrot.lane.b32.xlu0 %v6161_v17, %s6084_s9 }
 0x489   :  { %982 = vrot.lane.b32.xlu0 %v6157_v16, %s6085_s10 }
 0x48d   :  { %1062 = vrot.lane.b32.xlu0 %v6161_v17, %s6086_s11 }
 0x49e   :  { %v6220_v59 = vpop.f32.mrb[2].mxu0 }
 0x49f   :  { %v5419_v60 = vpop.f32.mrb[3].mxu0 }
 0x4a2   :  { %v551_v61 = vpop.f32.mrb[4].mxu0 }
 0x4a3   :  { %v5429_v62 = vpop.f32.mrb[5].mxu0  ;;  %v633_v63 = vsel %vm295_vm6, %v551_v61, -inf }
 0x4ac   :  { %634 = vmax.xlane.f32.xlu0 %v633_v63 }
 0x4c2   :  { %661 = vrot.lane.b32.xlu0 %v6157_v16, %s6084_s9 }
 0x4c6   :  { %1166 = vrot.lane.b32.xlu0 %v6157_v16, %s6087_s12 }
 0x4ca   :  { %1407 = vrot.lane.b32.xlu0 %v6157_v16, %s6088_s13 }
 0x4ce   :  { %1405 = vrot.lane.b32.xlu0 %v6157_v16, %s6089_s14 }
 0x4d2   :  { %1485 = vrot.lane.b32.xlu0 %v6161_v17, %s6088_s13 }
 0x4d6   :  { %1483 = vrot.lane.b32.xlu0 %v6161_v17, %s6089_s14 }
 0x4fc   :  { %v638_v0 = vpop.xlane.xlu0 %637 }
 0x4fd   :  { %v640_v1 = vsub.f32 %v629_v56, %v638_v0 }
 0x4ff   :  { %v643_v2 = vmul.f32 1.442695, %v640_v1 }
 0x500   :  { %v738_v3 = vpop.permute.xlu0 %737 }
 0x501   :  { %5913 = vpow2.f32 %v643_v2  ;;  %5441 = vmatpush3.msra.mxu1 %v738_v3 }
 0x502   :  { %5455 = vmatprep.subr.mxu1 %v6078_v12 }
 0x504   :  { %v983_v6 = vpop.permute.xlu0 %982 }
 0x508   :  { %v1063_v7 = vpop.permute.xlu0 %1062 }
 0x50b   :  { %v5914_v4 = vpop.eup %5913 }
 0x50c   :  { %v648_v5 = vsel %vm295_vm6, %v5914_v4, 0.0 }
 0x50d   :  { %649 = vadd.xlane.f32.xlu1 %v648_v5 }
 0x51e   :  { %984 = vrot.lane.b32.xlu1 %v6157_v16, %s6086_s11 }
 0x522   :  { %1060 = vrot.lane.b32.xlu1 %v6161_v17, %s6085_s10 }
 0x539   :  { %v635_v10 = vpop.xlane.xlu0 %634 }
 0x53a   :  { %v639_v13 = vsub.f32 %v551_v61, %v635_v10 }
 0x53c   :  { %v641_v14 = vmul.f32 1.442695, %v639_v13 }
 0x53d   :  { %v662_v15 = vpop.permute.xlu0 %661 }
 0x53e   :  { %5915 = vpow2.f32 %v641_v14  ;;  %5436 = vmatpush3.msra.mxu0 %v662_v15 }
 0x53f   :  { %5445 = vmatprep.subr.msk.mxu0 %vm61_vm0, %v813_v34 }
 0x541   :  { %v1167_v46 = vpop.permute.xlu0 %1166 }
 0x548   :  { %v5916_v18 = vpop.eup %5915 }
 0x549   :  { %v645_v19 = vsel %vm295_vm6, %v5916_v18, 0.0 }
 0x54a   :  { %646 = vadd.xlane.f32.xlu1 %v645_v19 }
 0x59a   :  { %v650_v20 = vpop.xlane.xlu1 %649 }
 0x59b   :  { %5917 = vrcp.f32 %v650_v20 }
 0x59e   :  { %v985_v26 = vpop.permute.xlu1 %984 }
 0x5a2   :  { %v1061_v27 = vpop.permute.xlu1 %1060 }
 0x5a5   :  { %v5918_v21 = vpop.eup %5917 }
 0x5a6   :  { %v654_v22 = vmul.f32 %v5918_v21, %v650_v20 }
 0x5a8   :  { %v656_v23 = vsub.f32 2.0, %v654_v22 }
 0x5aa   :  { %v658_v24 = vmul.f32 %v5918_v21, %v656_v23 }
 0x5ac   :  { %v660_v25 = vmul.f32 %v5914_v4, %v658_v24 }
 0x5ae   :  { %5443 = vmatmul.mubr.msk.f32.vlgmr.msra.gmra.mrb[8].mxu1 %vm295_vm6, %v660_v25 }
 0x5af   :  { %5456 = vmatpush3.xpose.msk.msra.mxu1 %vm143_vm5, %v985_v26  ;;  %5457 = vmatprep.mubr.msk.f32.mxu1 %vm6079_vm4, %v6078_v12 }
 0x5b0   :  { %5460 = vmatprep.subr.mxu1 %v6078_v12 }
 0x5b2   :  { %5458 = vmatmul.mubr.msk.f32.vlgmr.msra.gmra.mrb[10].mxu1 %vm143_vm5, %v983_v6  ;;  %v1408_v6 = vpop.permute.xlu0 %1407 }
 0x5b3   :  { %5461 = vmatpush3.xpose.msk.msra.mxu1 %vm143_vm5, %v1063_v7  ;;  %5462 = vmatprep.mubr.msk.f32.mxu1 %vm6079_vm4, %v6078_v12 }
 0x5b4   :  { %5470 = vmatprep.subr.mxu1 %v6078_v12 }
 0x5b6   :  { %5463 = vmatmul.mubr.msk.f32.vlgmr.msra.gmra.mrb[12].mxu1 %vm143_vm5, %v1061_v27  ;;  %v1406_v10 = vpop.permute.xlu0 %1405 }
 0x5b7   :  { %5472 = vmatprep.mubr.msk.f32.mxu1 %vm6079_vm4, %v6078_v12 }
 0x5ba   :  { %v1486_v15 = vpop.permute.xlu0 %1485 }
 0x5be   :  { %v1484_v20 = vpop.permute.xlu0 %1483 }
 0x5d7   :  { %v647_v28 = vpop.xlane.xlu1 %646 }
 0x5d8   :  { %5919 = vrcp.f32 %v647_v28 }
 0x5e2   :  { %v5920_v29 = vpop.eup %5919 }
 0x5e3   :  { %v653_v30 = vmul.f32 %v5920_v29, %v647_v28 }
 0x5e5   :  { %v655_v31 = vsub.f32 2.0, %v653_v30 }
 0x5e7   :  { %v657_v32 = vmul.f32 %v5920_v29, %v655_v31 }
 0x5e9   :  { %v659_v33 = vmul.f32 %v5916_v18, %v657_v32 }
 0x5eb   :  { %5438 = vmatmul.mubr.msk.f32.vlgmr.msra.gmra.mrb[6].mxu0 %vm295_vm6, %v659_v33 }
 0x5ec   :  { %5446 = vmatpush3.msk.msra.mxu0 %vm61_vm0, %v813_v34 }
 0x5ed   :  { %5450 = vmatprep.subr.msk.mxu0 %vm61_vm0, %v476_v35 }
 0x681   :  { %v809_v36 = vpop.f32.mrb[8].mxu1 }
 0x682   :  { %v5444_v37 = vpop.f32.mrb[9].mxu1 }
 0x685   :  { %v1056_v38 = vpop.f32.mrb[10].mxu1 }
 0x686   :  { %v5459_v39 = vpop.f32.mrb[11].mxu1  ;;  %v1138_v40 = vsel %vm295_vm6, %v1056_v38, -inf }
 0x687   :  { %1139 = vmax.xlane.f32.xlu1 %v1138_v40 }
 0x689   :  { %v1134_v41 = vpop.f32.mrb[12].mxu1 }
 0x68a   :  { %v5464_v42 = vpop.f32.mrb[13].mxu1  ;;  %v1141_v43 = vsel %vm295_vm6, %v1134_v41, -inf }
 0x68b   :  { %1142 = vmax.xlane.f32.xlu1 %v1141_v43 }
 0x6be   :  { %v733_v44 = vpop.f32.mrb[6].mxu0 }
 0x6bf   :  { %v5439_v45 = vpop.f32.mrb[7].mxu0  ;;  %5447 = vmatprep.mubr.msk.f32.mxu0 %vm143_vm5, %v733_v44 }
 0x6c0   :  { %5448 = vmatmul.mubr.msk.f32.vlgmr.msra.gmra.mrb[8].mxu0 %vm143_vm5, %v809_v36 }
 0x6c1   :  { %5452 = vmatprep.mubr.msk.f32.mxu0 %vm143_vm5, %v6220_v59  ;;  %5451 = vmatpush3.msk.msra.mxu0 %vm61_vm0, %v476_v35 }
 0x6c2   :  { %5465 = vmatprep.subr.mxu0 %v6078_v12 }
 0x6c8   :  { %5453 = vmatmul.mubr.msk.f32.vlgmr.msra.gmra.mrb[8].mxu0 %vm143_vm5, %v6211_v54  ;;  %v1318_v54 = vld [vmem:[#allocation5 + $0x48] sm:$0x3f] }
 0x6c9   :  { %5466 = vmatpush3.msra.mxu0 %v1167_v46  ;;  %5467 = vmatprep.mubr.msk.f32.mxu0 %vm6079_vm4, %v6078_v12 }
 0x6ca   :  { %5475 = vmatprep.subr.msk.mxu0 %vm61_vm0, %v1318_v54 }
 0x714   :  { %v1140_v47 = vpop.xlane.xlu1 %1139 }
 0x715   :  { %v1144_v48 = vsub.f32 %v1056_v38, %v1140_v47 }
 0x717   :  { %v1146_v49 = vmul.f32 1.442695, %v1144_v48 }
 0x718   :  { %v1143_v50 = vpop.xlane.xlu1 %1142 }
 0x719   :  { %5921 = vpow2.f32 %v1146_v49  ;;  %v1145_v51 = vsub.f32 %v1134_v41, %v1143_v50 }
 0x71b   :  { %v1148_v52 = vmul.f32 1.442695, %v1145_v51 }
 0x71d   :  { %5923 = vpow2.f32 %v1148_v52 }
 0x723   :  { %v5922_v53 = vpop.eup %5921 }
 0x724   :  { %v1150_v55 = vsel %vm295_vm6, %v5922_v53, 0.0 }
 0x725   :  { %1151 = vadd.xlane.f32.xlu1 %v1150_v55 }
 0x727   :  { %v5924_v56 = vpop.eup %5923 }
 0x728   :  { %v1153_v57 = vsel %vm295_vm6, %v5924_v56, 0.0 }
 0x729   :  { %1154 = vadd.xlane.f32.xlu1 %v1153_v57 }
 0x73a   :  { %1242 = vrot.lane.b32.xlu1 %v6161_v17, %s6087_s12 }
 0x7b2   :  { %v1152_v58 = vpop.xlane.xlu1 %1151 }
 0x7b3   :  { %5925 = vrcp.f32 %v1152_v58 }
 0x7b6   :  { %v1155_v59 = vpop.xlane.xlu1 %1154 }
 0x7b7   :  { %5927 = vrcp.f32 %v1155_v59 }
 0x7ba   :  { %v1243_v60 = vpop.permute.xlu1 %1242 }
 0x7bb   :  { %5471 = vmatpush3.msra.mxu1 %v1243_v60 }
 0x7bc   :  { %5480 = vmatprep.subr.mxu1 %v6078_v12 }
 0x7bd   :  { %v5926_v61 = vpop.eup %5925 }
 0x7be   :  { %v1158_v62 = vmul.f32 %v5926_v61, %v1152_v58 }
 0x7c0   :  { %v1160_v63 = vsub.f32 2.0, %v1158_v62  ;;  %v1741_v62 = vld [vmem:[#allocation5 + $0x50] sm:$0x3f] }
 0x7c1   :  { %v5928_v0 = vpop.eup %5927 }
 0x7c2   :  { %v1162_v1 = vmul.f32 %v5926_v61, %v1160_v63  ;;  %v1159_v2 = vmul.f32 %v5928_v0, %v1155_v59 }
 0x7c4   :  { %v1164_v3 = vmul.f32 %v5922_v53, %v1162_v1  ;;  %v1161_v4 = vsub.f32 2.0, %v1159_v2 }
 0x7c6   :  { %v1163_v5 = vmul.f32 %v5928_v0, %v1161_v4  ;;  %5468 = vmatmul.mubr.msk.f32.vlgmr.msra.gmra.mrb[10].mxu0 %vm295_vm6, %v1164_v3 }
 0x7c7   :  { %5476 = vmatpush3.msk.msra.mxu0 %vm61_vm0, %v1318_v54 }
 0x7c8   :  { %v1165_v7 = vmul.f32 %v5924_v56, %v1163_v5  ;;  %5485 = vmatprep.subr.mxu0 %v6078_v12 }
 0x7ca   :  { %5473 = vmatmul.mubr.msk.f32.vlgmr.msra.gmra.mrb[14].mxu1 %vm295_vm6, %v1165_v7 }
 0x7cb   :  { %5481 = vmatpush3.xpose.msk.msra.mxu1 %vm143_vm5, %v1408_v6  ;;  %5482 = vmatprep.mubr.msk.f32.mxu1 %vm6079_vm4, %v6078_v12 }
 0x7cc   :  { %5490 = vmatprep.subr.mxu1 %v6078_v12 }
 0x7ce   :  { %5483 = vmatmul.mubr.msk.f32.vlgmr.msra.gmra.mrb[16].mxu1 %vm143_vm5, %v1406_v10 }
 0x7cf   :  { %5492 = vmatprep.mubr.msk.f32.mxu1 %vm6079_vm4, %v6078_v12 }
 0x899   :  { %v1238_v13 = vpop.f32.mrb[10].mxu0 }
 0x89a   :  { %v5469_v14 = vpop.f32.mrb[11].mxu0  ;;  %5477 = vmatprep.mubr.msk.f32.mxu0 %vm143_vm5, %v1238_v13 }
 0x89d   :  { %v1314_v18 = vpop.f32.mrb[14].mxu1 }
 0x89e   :  { %v5474_v19 = vpop.f32.mrb[15].mxu1  ;;  %5478 = vmatmul.mubr.msk.f32.vlgmr.msra.gmra.mrb[8].mxu0 %vm143_vm5, %v1314_v18 }
 0x89f   :  { %5486 = vmatpush3.xpose.msk.msra.mxu0 %vm143_vm5, %v1486_v15  ;;  %5487 = vmatprep.mubr.msk.f32.mxu0 %vm6079_vm4, %v6078_v12 }
 0x8a0   :  { %5495 = vmatprep.subr.mxu0 %v6078_v12 }
 0x8a1   :  { %v1479_v21 = vpop.f32.mrb[16].mxu1 }
 0x8a2   :  { %v5484_v22 = vpop.f32.mrb[17].mxu1  ;;  %5488 = vmatmul.mubr.msk.f32.vlgmr.msra.gmra.mrb[12].mxu0 %vm143_vm5, %v1484_v20  ;;  %v1561_v23 = vsel %vm295_vm6, %v1479_v21, -inf }
 0x8a3   :  { %1562 = vmax.xlane.f32.xlu1 %v1561_v23  ;;  %5497 = vmatprep.mubr.msk.f32.mxu0 %vm6079_vm4, %v6078_v12 }
 0x8b4   :  { %1830 = vrot.lane.b32.xlu1 %v6157_v16, %s6090_s15 }
 0x8b8   :  { %1828 = vrot.lane.b32.xlu1 %v6157_v16, %s6091_s16 }
 0x8bc   :  { %1906 = vrot.lane.b32.xlu1 %v6161_v17, %s6091_s16 }
 0x930   :  { %v1563_v24 = vpop.xlane.xlu1 %1562 }
 0x931   :  { %v1567_v25 = vsub.f32 %v1479_v21, %v1563_v24 }
 0x933   :  { %v1569_v26 = vmul.f32 1.442695, %v1567_v25 }
 0x934   :  { %v1831_v37 = vpop.permute.xlu1 %1830 }
 0x935   :  { %5929 = vpow2.f32 %v1569_v26 }
 0x938   :  { %v1829_v40 = vpop.permute.xlu1 %1828 }
 0x93c   :  { %v1907_v41 = vpop.permute.xlu1 %1906 }
 0x93f   :  { %v5930_v27 = vpop.eup %5929 }
 0x940   :  { %v1573_v28 = vsel %vm295_vm6, %v5930_v27, 0.0 }
 0x941   :  { %1574 = vadd.xlane.f32.xlu0 %v1573_v28 }
 0x957   :  { %1589 = vrot.lane.b32.xlu0 %v6157_v16, %s6092_s17 }
 0x95b   :  { %1908 = vrot.lane.b32.xlu0 %v6161_v17, %s6090_s15 }
 0x975   :  { %v1557_v29 = vpop.f32.mrb[12].mxu0 }
 0x976   :  { %v5489_v30 = vpop.f32.mrb[13].mxu0  ;;  %v1564_v31 = vsel %vm295_vm6, %v1557_v29, -inf }
 0x977   :  { %v2164_v30 = vld [vmem:[#allocation5 + $0x58] sm:$0x3f] }
 0x97a   :  { %1565 = vmax.xlane.f32.xlu0 %v1564_v31 }
 0x990   :  { %1665 = vrot.lane.b32.xlu0 %v6161_v17, %s6092_s17 }
 0x994   :  { %2012 = vrot.lane.b32.xlu0 %v6157_v16, %s6093_s18 }
 0x9ce   :  { %v1575_v32 = vpop.xlane.xlu0 %1574 }
 0x9cf   :  { %5931 = vrcp.f32 %v1575_v32 }
 0x9d2   :  { %v1590_v33 = vpop.permute.xlu0 %1589 }
 0x9d3   :  { %5491 = vmatpush3.msra.mxu1 %v1590_v33 }
 0x9d4   :  { %5505 = vmatprep.subr.mxu1 %v6078_v12 }
 0x9d6   :  { %v1909_v16 = vpop.permute.xlu0 %1908 }
 0x9d9   :  { %v5932_v34 = vpop.eup %5931 }
 0x9da   :  { %v1581_v35 = vmul.f32 %v5932_v34, %v1575_v32 }
 0x9dc   :  { %v1583_v36 = vsub.f32 2.0, %v1581_v35  ;;  %v2252_v35 = vlaneseq }
 0x9de   :  { %v1585_v38 = vmul.f32 %v5932_v34, %v1583_v36  ;;  %v6349_v36 = vshrl.u32 %v2252_v35, 7  ;;  %v2404_v35 = vld [vmem:[#allocation5 + $0xd8] sm:$0xff] }
 0x9e0   :  { %v1587_v39 = vmul.f32 %v5930_v27, %v1585_v38  ;;  %v6352_v38 = vld [vmem:[#allocation5 + $0x108] sm:$0x3f] }
 0x9e2   :  { %5493 = vmatmul.mubr.msk.f32.vlgmr.msra.gmra.mrb[18].mxu1 %vm295_vm6, %v1587_v39 }
 0x9e3   :  { %5506 = vmatpush3.xpose.msk.msra.mxu1 %vm143_vm5, %v1831_v37  ;;  %5507 = vmatprep.mubr.msk.f32.mxu1 %vm6079_vm4, %v6078_v12  ;;  %v2254_v37 = vsub.s32 0, %v6349_v36 }
 0x9e4   :  { %5510 = vmatprep.subr.mxu1 %v6078_v12 }
 0x9e5   :  { %v2255_v39 = vrot.slane %v6352_v38, %v2254_v37 }
 0x9e6   :  { %5508 = vmatmul.mubr.msk.f32.vlgmr.msra.gmra.mrb[20].mxu1 %vm143_vm5, %v1829_v40 }
 0x9e7   :  { %5511 = vmatpush3.xpose.msk.msra.mxu1 %vm143_vm5, %v1909_v16  ;;  %5512 = vmatprep.mubr.msk.f32.mxu1 %vm6079_vm4, %v6078_v12 }
 0x9e8   :  { %5520 = vmatprep.subr.mxu1 %v6078_v12 }
 0x9ea   :  { %5513 = vmatmul.mubr.msk.f32.vlgmr.msra.gmra.mrb[22].mxu1 %vm143_vm5, %v1907_v41 }
 0x9eb   :  { %5522 = vmatprep.mubr.msk.f32.mxu1 %vm6079_vm4, %v6078_v12 }
 0xa07   :  { %v1566_v42 = vpop.xlane.xlu0 %1565 }
 0xa08   :  { %v1568_v43 = vsub.f32 %v1557_v29, %v1566_v42 }
 0xa0a   :  { %v1571_v44 = vmul.f32 1.442695, %v1568_v43 }
 0xa0b   :  { %v1666_v45 = vpop.permute.xlu0 %1665 }
 0xa0c   :  { %5933 = vpow2.f32 %v1571_v44  ;;  %5496 = vmatpush3.msra.mxu0 %v1666_v45 }
 0xa0d   :  { %5500 = vmatprep.subr.msk.mxu0 %vm61_vm0, %v1741_v62 }
 0xa0f   :  { %v2013_v14 = vpop.permute.xlu0 %2012 }
 0xa16   :  { %v5934_v46 = vpop.eup %5933 }
 0xa17   :  { %v1576_v47 = vsel %vm295_vm6, %v5934_v46, 0.0 }
 0xa18   :  { %1577 = vadd.xlane.f32.xlu1 %v1576_v47 }
 0xaa5   :  { %v1578_v48 = vpop.xlane.xlu1 %1577 }
 0xaa6   :  { %5935 = vrcp.f32 %v1578_v48 }
 0xab0   :  { %v5936_v49 = vpop.eup %5935 }
 0xab1   :  { %v1582_v50 = vmul.f32 %v5936_v49, %v1578_v48 }
 0xab3   :  { %v1584_v51 = vsub.f32 2.0, %v1582_v50 }
 0xab5   :  { %v1586_v52 = vmul.f32 %v5936_v49, %v1584_v51  ;;  %v1661_v53 = vpop.f32.mrb[18].mxu1 }
 0xab6   :  { %v5494_v55 = vpop.f32.mrb[19].mxu1 }
 0xab7   :  { %v1588_v56 = vmul.f32 %v5934_v46, %v1586_v52 }
 0xab9   :  { %5498 = vmatmul.mubr.msk.f32.vlgmr.msra.gmra.mrb[14].mxu0 %vm295_vm6, %v1588_v56  ;;  %v1902_v57 = vpop.f32.mrb[20].mxu1 }
 0xaba   :  { %5502 = vmatprep.mubr.msk.f32.mxu0 %vm143_vm5, %v1661_v53  ;;  %v5509_v54 = vpop.f32.mrb[21].mxu1  ;;  %v1984_v58 = vsel %vm295_vm6, %v1902_v57, -inf  ;;  %5501 = vmatpush3.msk.msra.mxu0 %vm61_vm0, %v1741_v62  ;;  %v2395_v62 = vld [vmem:[#allocation5 + $0x90] sm:$0xff] }
 0xabb   :  { %1985 = vmax.xlane.f32.xlu1 %v1984_v58  ;;  %5515 = vmatprep.subr.mxu0 %v6078_v12  ;;  %v2301_v58 = vld [vmem:[#allocation5 + $0x70] sm:$0xff] }
 0xabd   :  { %v1980_v59 = vpop.f32.mrb[22].mxu1 }
 0xabe   :  { %v5514_v60 = vpop.f32.mrb[23].mxu1  ;;  %v1987_v61 = vsel %vm295_vm6, %v1980_v59, -inf }
 0xabf   :  { %1988 = vmax.xlane.f32.xlu1 %v1987_v61  ;;  %v2394_v61 = vld [vmem:[#allocation5 + $0x88] sm:$0xff] }
 0xb48   :  { %v1986_v63 = vpop.xlane.xlu1 %1985 }
 0xb49   :  { %v1990_v0 = vsub.f32 %v1902_v57, %v1986_v63  ;;  %v2300_v57 = vld [vmem:[#allocation5 + $0x68] sm:$0xff]  ;;  %v5783_v63 = vpack.c.bf16 %v2395_v62, %v2394_v61 }
 0xb4b   :  { %v1992_v1 = vmul.f32 1.442695, %v1990_v0 }
 0xb4c   :  { %v1989_v2 = vpop.xlane.xlu1 %1988 }
 0xb4d   :  { %5937 = vpow2.f32 %v1992_v1  ;;  %v1991_v3 = vsub.f32 %v1980_v59, %v1989_v2  ;;  %v2302_v59 = vld [vmem:[#allocation5 + $0x78] sm:$0x3f] }
 0xb4e   :  { %v5777_v60 = vpack.c.bf16 %v2302_v59, %v2301_v58 }
 0xb4f   :  { %v1994_v4 = vmul.f32 1.442695, %v1991_v3 }
 0xb51   :  { %5939 = vpow2.f32 %v1994_v4 }
 0xb57   :  { %v5938_v5 = vpop.eup %5937 }
 0xb58   :  { %v1996_v6 = vsel %vm295_vm6, %v5938_v5, 0.0 }
 0xb59   :  { %1997 = vadd.xlane.f32.xlu1 %v1996_v6  ;;  %v2289_v6 = vsub.s32 1, %v6349_v36 }
 0xb5b   :  { %v5940_v7 = vpop.eup %5939 }
 0xb5c   :  { %v1999_v10 = vsel %vm295_vm6, %v5940_v7, 0.0 }
 0xb5d   :  { %2000 = vadd.xlane.f32.xlu1 %v1999_v10  ;;  %v2290_v10 = vrot.slane %v6352_v38, %v2289_v6 }
 0xb6e   :  { %2088 = vrot.lane.b32.xlu1 %v6161_v17, %s6093_s18 }
 0xb8c   :  { %v1737_v13 = vpop.f32.mrb[14].mxu0 }
 0xb8d   :  { %v5499_v15 = vpop.f32.mrb[15].mxu0  ;;  %5503 = vmatmul.mubr.msk.f32.vlgmr.msra.gmra.mrb[8].mxu0 %vm143_vm5, %v1737_v13 }
 0xb8e   :  { %5516 = vmatpush3.msra.mxu0 %v2013_v14  ;;  %5517 = vmatprep.mubr.msk.f32.mxu0 %vm6079_vm4, %v6078_v12 }
 0xb8f   :  { %5525 = vmatprep.subr.msk.mxu0 %vm61_vm0, %v2164_v30 }
 0xbe6   :  { %v1998_v18 = vpop.xlane.xlu1 %1997 }
 0xbe7   :  { %5941 = vrcp.f32 %v1998_v18 }
 0xbea   :  { %v2001_v19 = vpop.xlane.xlu1 %2000 }
 0xbeb   :  { %5943 = vrcp.f32 %v2001_v19 }
 0xbee   :  { %v2089_v20 = vpop.permute.xlu1 %2088 }
 0xbef   :  { %5521 = vmatpush3.msra.mxu1 %v2089_v20 }
 0xbf1   :  { %v5942_v21 = vpop.eup %5941 }
 0xbf2   :  { %v2004_v22 = vmul.f32 %v5942_v21, %v1998_v18 }
 0xbf4   :  { %v2006_v23 = vsub.f32 2.0, %v2004_v22  ;;  %v2396_v22 = vld [vmem:[#allocation5 + $0x98] sm:$0xff] }
 0xbf5   :  { %v5944_v24 = vpop.eup %5943 }
 0xbf6   :  { %v2008_v17 = vmul.f32 %v5942_v21, %v2006_v23  ;;  %v2005_v25 = vmul.f32 %v5944_v24, %v2001_v19  ;;  %v2397_v23 = vld [vmem:[#allocation5 + $0xa0] sm:$0xff] }
 0xbf8   :  { %v2010_v26 = vmul.f32 %v5938_v5, %v2008_v17  ;;  %v2007_v27 = vsub.f32 2.0, %v2005_v25  ;;  %v5787_v25 = vpack.c.bf16 %v2397_v23, %v2396_v22 }
 0xbfa   :  { %v2009_v28 = vmul.f32 %v5944_v24, %v2007_v27  ;;  %5518 = vmatmul.mubr.msk.f32.vlgmr.msra.gmra.mrb[16].mxu0 %vm295_vm6, %v2010_v26  ;;  %v2398_v26 = vld [vmem:[#allocation5 + $0xa8] sm:$0xff]  ;;  %v2399_v27 = vld [vmem:[#allocation5 + $0xb0] sm:$0xff] }
 0xbfb   :  { %5526 = vmatpush3.msk.msra.mxu0 %vm61_vm0, %v2164_v30  ;;  %v2401_v30 = vld [vmem:[#allocation5 + $0xc0] sm:$0xff] }
 0xbfc   :  { %v2011_v29 = vmul.f32 %v5940_v7, %v2009_v28  ;;  %v2295_v7 = vsub.s32 2, %v6349_v36  ;;  %v5791_v28 = vpack.c.bf16 %v2399_v27, %v2398_v26  ;;  %v2519_v26 = vsub.s32 4, %v6349_v36 }
 0xbfd   :  { %v2525_v27 = vsub.s32 5, %v6349_v36 }
 0xbfe   :  { %5523 = vmatmul.mubr.msk.f32.vlgmr.msra.gmra.mrb[24].mxu1 %vm295_vm6, %v2011_v29  ;;  %v2296_v15 = vrot.slane %v6352_v38, %v2295_v7  ;;  %v2400_v29 = vld [vmem:[#allocation5 + $0xb8] sm:$0xff] }
 0xccd   :  { %v2084_v31 = vpop.f32.mrb[16].mxu0 }
 0xcce   :  { %v5519_v32 = vpop.f32.mrb[17].mxu0  ;;  %5527 = vmatprep.mubr.msk.f32.mxu0 %vm143_vm5, %v2084_v31  ;;  %v5795_v31 = vpack.c.bf16 %v2401_v30, %v2400_v29 }
 0xccf   :  { %v2402_v32 = vld [vmem:[#allocation5 + $0xc8] sm:$0xff] }
 0xcd1   :  { %v2160_v33 = vpop.f32.mrb[24].mxu1 }
 0xcd2   :  { %v5524_v34 = vpop.f32.mrb[25].mxu1  ;;  %5528 = vmatmul.mubr.msk.f32.vlgmr.msra.gmra.mrb[8].mxu0 %vm143_vm5, %v2160_v33  ;;  %v2403_v33 = vld [vmem:[#allocation5 + $0xd0] sm:$0xff] }
 0xcd3   :  { %v5799_v34 = vpack.c.bf16 %v2403_v33, %v2402_v32 }
 0xda5   :  { %v5529_v40 = vpop.f32.mrb[8].mxu0 }
 0xda6   :  { %v2257_v16 = vadd.f32 %v5529_v40, %v2255_v39  ;;  %v2240_v41 = vpop.f32.mrb[9].mxu0 }
 0xda7   :  { %v2256_v42 = vadd.f32 %v2255_v39, %v2240_v41  ;;  %v2405_v39 = vld [vmem:[#allocation5 + $0xe0] sm:$0xff]  ;;  %v2407_v41 = vld [vmem:[#allocation5 + $0xf0] sm:$0xff] }
 0xda8   :  { %v2259_v43 = vadd.f32 %v2257_v16, %v6145_v11  ;;  %v5803_v40 = vpack.c.bf16 %v2405_v39, %v2404_v35  ;;  %v2406_v16 = vld [vmem:[#allocation5 + $0xe8] sm:$0xff] }
 0xda9   :  { %v2258_v44 = vadd.f32 %v2256_v42, %v6139_v9  ;;  %v2299_v9 = vld [vmem:[#allocation5 + $0x60] sm:$0xff]  ;;  %v5807_v42 = vpack.c.bf16 %v2407_v41, %v2406_v16  ;;  %v5166_v16 = vld [vmem:[#allocation5 + $0x130] ss:$0 sm:$0xff] }
 0xdaa   :  { %v2263_v45 = vsel %vm54_vm1, %v2259_v43, 0.0  ;;  %v5773_v54 = vpack.c.bf16 %v2300_v57, %v2299_v9 }
 0xdab   :  { %2264 = vadd.xlane.f32.xlu1 %v2263_v45  ;;  %v2260_v46 = vsel %vm54_vm1, %v2258_v44, 0.0 }
 0xdac   :  { %2261 = vadd.xlane.f32.xlu0 %v2260_v46  ;;  %5774 = vmatprep.subr.bf16.mxu0 %v5773_v54  ;;  %v5162_v46 = vld [vmem:[#allocation5 + $0x80] ss:$0 sm:$0xff] }
 0xdad   :  { %5776 = vmatpush3.bf16.msra.mxu0 %v5773_v54 }
 0xdae   :  { %5779 = vmatprep.subr.msk.bf16.mxu0 %vm6135_vm3, %v5777_v60 }
 0xdb1   :  { %5782 = vmatpush3.bf16.msk.msra.mxu0 %vm6135_vm3, %v5777_v60 }
 0xdb2   :  { %5784 = vmatprep.subr.bf16.mxu0 %v5783_v63 }
 0xe38   :  { %v2265_v47 = vpop.xlane.xlu1 %2264 }
 0xe39   :  { %v2268_v48 = vmul.f32 0.033333335, %v2265_v47  ;;  %v2262_v49 = vpop.xlane.xlu0 %2261 }
 0xe3a   :  { %v2267_v50 = vmul.f32 0.033333335, %v2262_v49 }
 0xe3b   :  { %v2270_v51 = vsub.f32 %v2259_v43, %v2268_v48  ;;  %v2408_v43 = vld [vmem:[#allocation5 + $0xf8] sm:$0xff] }
 0xe3c   :  { %v2269_v52 = vsub.f32 %v2258_v44, %v2267_v50  ;;  %v2409_v44 = vld [vmem:[#allocation5 + $0x100] sm:$0xff] }
 0xe3d   :  { %v2272_v56 = vmul.f32 %v2270_v51, %v2270_v51  ;;  %v5811_v45 = vpack.c.bf16 %v2409_v44, %v2408_v43 }
 0xe3e   :  { %v2271_v53 = vmul.f32 %v2269_v52, %v2269_v52 }
 0xe3f   :  { %v2276_v11 = vsel %vm54_vm1, %v2272_v56, 0.0 }
 0xe40   :  { %v2273_v55 = vsel %vm54_vm1, %v2271_v53, 0.0  ;;  %v2412_v53 = vsub.s32 3, %v6349_v36 }
 0xe41   :  { %2274 = vadd.xlane.f32.xlu0 %v2273_v55 }
 0xe42   :  { %v2413_v55 = vrot.slane %v6352_v38, %v2412_v53 }
 0xe45   :  { %2277 = vadd.xlane.f32.xlu0 %v2276_v11 }
 0xece   :  { %v2275_v0 = vpop.xlane.xlu0 %2274 }
 0xecf   :  { %v2279_v1 = vmul.f32 0.033333335, %v2275_v0 }
 0xed1   :  { %v2281_v2 = vadd.f32 1e-05, %v2279_v1 }
 0xed2   :  { %v2278_v3 = vpop.xlane.xlu0 %2277 }
 0xed3   :  { %5945 = vrsqrt.f32 %v2281_v2  ;;  %v2280_v4 = vmul.f32 0.033333335, %v2278_v3 }
 0xed5   :  { %v2282_v5 = vadd.f32 1e-05, %v2280_v4 }
 0xed7   :  { %5947 = vrsqrt.f32 %v2282_v5 }
 0xedd   :  { %v5946_v13 = vpop.eup %5945 }
 0xede   :  { %v2285_v14 = vmul.f32 %v5946_v13, %v2269_v52  ;;  %v2529_v13 = vld [vmem:[#allocation5 + $0x110] sm:$0xff] }
 0xee0   :  { %v2291_v18 = vmul.f32 %v2290_v10, %v2285_v14  ;;  %v2530_v14 = vld [vmem:[#allocation5 + $0x118] sm:$0xff] }
 0xee1   :  { %v5948_v19 = vpop.eup %5947 }
 0xee2   :  { %v2286_v20 = vmul.f32 %v5948_v19, %v2270_v51  ;;  %v2297_v21 = vadd.f32 %v2296_v15, %v2291_v18  ;;  %v2531_v18 = vld [vmem:[#allocation5 + $0x120] sm:$0xff]  ;;  %v2532_v19 = vld [vmem:[#allocation5 + $0x128] sm:$0x3f] }
 0xee4   :  { %v2292_v24 = vmul.f32 %v2290_v10, %v2286_v20  ;;  %5538 = vmatprep.mubr.msk.f32.mxu0 %vm54_vm1, %v2297_v21  ;;  %v5819_v20 = vpack.c.bf16 %v2532_v19, %v2531_v18 }
 0xee6   :  { %v2298_v17 = vadd.f32 %v2296_v15, %v2292_v24  ;;  %v5815_v15 = vpack.c.bf16 %v2530_v14, %v2529_v13 }
 0xee8   :  { %5539 = vmatmul.mubr.msk.f32.vlgmr.msra.gmra.mrb[18].mxu0 %vm54_vm1, %v2298_v17  ;;  %5816 = vmatprep.subr.bf16.mxu1 %v5815_v15 }
 0xee9   :  { %5786 = vmatpush3.bf16.msra.mxu0 %v5783_v63  ;;  %5818 = vmatpush3.bf16.msra.mxu1 %v5815_v15 }
 0xeea   :  { %5788 = vmatprep.subr.bf16.mxu0 %v5787_v25  ;;  %5821 = vmatprep.subr.msk.bf16.mxu1 %vm6135_vm3, %v5819_v20 }
 0xeed   :  { %5790 = vmatpush3.bf16.msra.mxu0 %v5787_v25  ;;  %5824 = vmatpush3.bf16.msk.msra.mxu1 %vm6135_vm3, %v5819_v20 }
 0xeee   :  { %5792 = vmatprep.subr.bf16.mxu0 %v5791_v28  ;;  %5587 = vmatprep.subr.mxu1 %v6078_v12 }
 0xef1   :  { %5794 = vmatpush3.bf16.msra.mxu0 %v5791_v28  ;;  %v2520_v28 = vrot.slane %v6352_v38, %v2519_v26 }
 0xef2   :  { %5796 = vmatprep.subr.bf16.mxu0 %v5795_v31 }
 0xef5   :  { %5798 = vmatpush3.bf16.msra.mxu0 %v5795_v31  ;;  %v2526_v31 = vrot.slane %v6352_v38, %v2525_v27 }
 0xef6   :  { %5800 = vmatprep.subr.bf16.mxu0 %v5799_v34 }
 0xef9   :  { %5802 = vmatpush3.bf16.msra.mxu0 %v5799_v34 }
 0xefa   :  { %5804 = vmatprep.subr.bf16.mxu0 %v5803_v40 }
 0xefd   :  { %5806 = vmatpush3.bf16.msra.mxu0 %v5803_v40 }
 0xefe   :  { %5808 = vmatprep.subr.bf16.mxu0 %v5807_v42 }
 0xf01   :  { %5810 = vmatpush3.bf16.msra.mxu0 %v5807_v42 }
 0xf02   :  { %5812 = vmatprep.subr.bf16.mxu0 %v5811_v45 }
 0xf05   :  { %5814 = vmatpush3.bf16.msra.mxu0 %v5811_v45 }
 0xf06   :  { %5612 = vmatprep.subr.mxu0 %v6078_v12 }
 0xfbb   :  { %v5540_v47 = vpop.f32.mrb[18].mxu0 }
 0xfbc   :  { %v2389_v48 = vadd.f32 %v5540_v47, %v5162_v46  ;;  %v2383_v49 = vpop.f32.mrb[19].mxu0 }
 0xfbd   :  { %v2384_v50 = vadd.f32 %v5162_v46, %v2383_v49 }
 0xfbe   :  { %v2393_v52 = vmax.f32 %v2389_v48, 0.0 }
 0xfbf   :  { %v2392_v51 = vmax.f32 %v2384_v50, 0.0 }
 0xfc1   :  { %5573 = vmatprep.mubr.f32.mxu0 %v2392_v51 }
 0xfc2   :  { %5574 = vmatmul.mubr.f32.vlgmr.msra.gmra.mrb[20].mxu0 %v2393_v52 }
 0xfc3   :  { %5614 = vmatprep.mubr.msk.f32.mxu0 %vm6079_vm4, %v6078_v12 }
0x1095   :  { %v5575_v56 = vpop.f32.mrb[20].mxu0 }
0x1096   :  { %v2480_v11 = vpop.f32.mrb[21].mxu0  ;;  %v2486_v9 = vadd.f32 %v5575_v56, %v2413_v55 }
0x1097   :  { %v2481_v57 = vadd.f32 %v2480_v11, %v2413_v55 }
0x1098   :  { %v2490_v59 = vadd.f32 %v2486_v9, %v2298_v17 }
0x1099   :  { %v2489_v54 = vadd.f32 %v2481_v57, %v2297_v21 }
0x109a   :  { %v2494_v60 = vsel %vm54_vm1, %v2490_v59, 0.0 }
0x109b   :  { %v2491_v58 = vsel %vm54_vm1, %v2489_v54, 0.0 }
0x109c   :  { %2492 = vadd.xlane.f32.xlu0 %v2491_v58 }
0x10a0   :  { %2495 = vadd.xlane.f32.xlu0 %v2494_v60 }
0x1129   :  { %v2493_v61 = vpop.xlane.xlu0 %2492 }
0x112a   :  { %v2497_v62 = vmul.f32 0.033333335, %v2493_v61 }
0x112c   :  { %v2499_v63 = vsub.f32 %v2489_v54, %v2497_v62 }
0x112d   :  { %v2496_v0 = vpop.xlane.xlu0 %2495 }
0x112e   :  { %v2498_v1 = vmul.f32 0.033333335, %v2496_v0  ;;  %v2501_v2 = vmul.f32 %v2499_v63, %v2499_v63 }
0x1130   :  { %v2500_v3 = vsub.f32 %v2490_v59, %v2498_v1  ;;  %v2503_v4 = vsel %vm54_vm1, %v2501_v2, 0.0 }
0x1131   :  { %2504 = vadd.xlane.f32.xlu0 %v2503_v4 }
0x1132   :  { %v2502_v5 = vmul.f32 %v2500_v3, %v2500_v3 }
0x1134   :  { %v2506_v10 = vsel %vm54_vm1, %v2502_v5, 0.0 }
0x1135   :  { %2507 = vadd.xlane.f32.xlu1 %v2506_v10 }
0x11be   :  { %v2505_v21 = vpop.xlane.xlu0 %2504 }
0x11bf   :  { %v2509_v22 = vmul.f32 0.033333335, %v2505_v21 }
0x11c1   :  { %v2511_v23 = vadd.f32 1e-05, %v2509_v22 }
0x11c2   :  { %v2508_v24 = vpop.xlane.xlu1 %2507 }
0x11c3   :  { %5949 = vrsqrt.f32 %v2511_v23  ;;  %v2510_v17 = vmul.f32 0.033333335, %v2508_v24 }
0x11c5   :  { %v2512_v25 = vadd.f32 1e-05, %v2510_v17 }
0x11c7   :  { %5951 = vrsqrt.f32 %v2512_v25 }
0x11cd   :  { %v5950_v29 = vpop.eup %5949 }
0x11ce   :  { %v2515_v30 = vmul.f32 %v5950_v29, %v2499_v63 }
0x11d0   :  { %v2521_v32 = vmul.f32 %v2520_v28, %v2515_v30 }
0x11d1   :  { %v5952_v33 = vpop.eup %5951 }
0x11d2   :  { %v2516_v34 = vmul.f32 %v5952_v33, %v2500_v3  ;;  %v6401_v35 = vadd.f32 %v2526_v31, %v2521_v32 }
0x11d4   :  { %v2522_v39 = vmul.f32 %v2520_v28, %v2516_v34  ;;  %5584 = vmatprep.mubr.msk.f32.mxu1 %vm54_vm1, %v6401_v35 }
0x11d6   :  { %v6405_v40 = vadd.f32 %v2526_v31, %v2522_v39 }
0x11d8   :  { %5585 = vmatmul.mubr.msk.f32.vlgmr.msra.gmra.mrb[26].mxu1 %vm54_vm1, %v6405_v40 }
0x11d9   :  { %5589 = vmatprep.mubr.msk.f32.mxu1 %vm6079_vm4, %v6078_v12 }
0x12ab   :  { %v5586_v41 = vpop.f32.mrb[26].mxu1 }
0x12ac   :  { %v6411_v38 = vadd.f32 %v5586_v41, %v5166_v16  ;;  %v2613_v42 = vpop.f32.mrb[27].mxu1 }
0x12ad   :  { %v6413_v43 = vadd.f32 %v5166_v16, %v2613_v42 }
0x12ae   :  { %2700 = vrot.lane.b32.xlu1 %v6411_v38, %s6080_s1 }
0x12af   :  { %2623 = vrot.lane.b32.xlu0 %v6413_v43, %s6080_s1 }
0x12b2   :  { %3037 = vrot.lane.b32.xlu1 %v6411_v38, %s6083_s8 }
0x12b3   :  { %3035 = vrot.lane.b32.xlu0 %v6411_v38, %s6082_s7 }
0x1320   :  { %v2701_v44 = vpop.permute.xlu1 %2700 }
0x1321   :  { %v2624_v45 = vpop.permute.xlu0 %2623 }
0x1322   :  { %5588 = vmatpush3.xpose.msk.msra.mxu1 %vm143_vm5, %v2624_v45 }
0x1323   :  { %5592 = vmatprep.subr.mxu1 %v6078_v12 }
0x1324   :  { %v3038_v46 = vpop.permute.xlu1 %3037 }
0x1325   :  { %5590 = vmatmul.mubr.msk.f32.vlgmr.msra.gmra.mrb[28].mxu1 %vm143_vm5, %v6413_v43  ;;  %5613 = vmatpush3.xpose.msk.msra.mxu0 %vm143_vm5, %v3038_v46  ;;  %v3036_v47 = vpop.permute.xlu0 %3035 }
0x1326   :  { %5593 = vmatpush3.xpose.msk.msra.mxu1 %vm143_vm5, %v2701_v44  ;;  %5594 = vmatprep.mubr.msk.f32.mxu1 %vm6079_vm4, %v6078_v12 }
0x1327   :  { %5597 = vmatprep.subr.mxu1 %v6078_v12  ;;  %5622 = vmatprep.subr.mxu0 %v6078_v12 }
0x1328   :  { %5615 = vmatmul.mubr.msk.f32.vlgmr.msra.gmra.mrb[22].mxu0 %vm143_vm5, %v3036_v47 }
0x1329   :  { %5595 = vmatmul.mubr.msk.f32.vlgmr.msra.gmra.mrb[30].mxu1 %vm143_vm5, %v6411_v38  ;;  %5624 = vmatprep.mubr.msk.f32.mxu0 %vm6079_vm4, %v6078_v12 }
0x132a   :  { %5599 = vmatprep.mubr.msk.f32.mxu1 %vm6079_vm4, %v6078_v12 }
0x13f8   :  { %v2695_v48 = vpop.f32.mrb[28].mxu1 }
0x13f9   :  { %v5591_v49 = vpop.f32.mrb[29].mxu1  ;;  %v2776_v50 = vsel %vm295_vm6, %v2695_v48, -inf }
0x13fa   :  { %2777 = vmax.xlane.f32.xlu1 %v2776_v50 }
0x13fb   :  { %v3109_v51 = vpop.f32.mrb[22].mxu0 }
0x13fc   :  { %v2772_v52 = vpop.f32.mrb[30].mxu1  ;;  %v5616_v55 = vpop.f32.mrb[23].mxu0  ;;  %v3116_v1 = vsel %vm295_vm6, %v3109_v51, -inf }
0x13fd   :  { %v5596_v56 = vpop.f32.mrb[31].mxu1  ;;  %v2779_v11 = vsel %vm295_vm6, %v2772_v52, -inf }
0x13fe   :  { %2780 = vmax.xlane.f32.xlu0 %v2779_v11 }
0x140b   :  { %2880 = vrot.lane.b32.xlu1 %v6411_v38, %s6081_s6 }
0x1487   :  { %v2778_v9 = vpop.xlane.xlu1 %2777 }
0x1488   :  { %v2782_v57 = vsub.f32 %v2695_v48, %v2778_v9 }
0x148a   :  { %v2784_v54 = vmul.f32 1.442695, %v2782_v57 }
0x148b   :  { %v2781_v58 = vpop.xlane.xlu0 %2780  ;;  %v2881_v2 = vpop.permute.xlu1 %2880 }
0x148c   :  { %5953 = vpow2.f32 %v2784_v54  ;;  %v2783_v59 = vsub.f32 %v2772_v52, %v2781_v58 }
0x148e   :  { %v2786_v60 = vmul.f32 1.442695, %v2783_v59 }
0x1490   :  { %5955 = vpow2.f32 %v2786_v60 }
0x1496   :  { %v5954_v61 = vpop.eup %5953 }
0x1497   :  { %v2788_v62 = vsel %vm295_vm6, %v5954_v61, 0.0 }
0x1498   :  { %2789 = vadd.xlane.f32.xlu0 %v2788_v62 }
0x149a   :  { %v5956_v63 = vpop.eup %5955 }
0x149b   :  { %v2791_v0 = vsel %vm295_vm6, %v5956_v63, 0.0 }
0x149c   :  { %2792 = vadd.xlane.f32.xlu1 %v2791_v0 }
0x14ad   :  { %2959 = vrot.lane.b32.xlu1 %v6413_v43, %s6083_s8 }
0x14ae   :  { %2804 = vrot.lane.b32.xlu0 %v6413_v43, %s6081_s6 }
0x14b2   :  { %2957 = vrot.lane.b32.xlu0 %v6413_v43, %s6082_s7 }
0x14d1   :  { %3117 = vmax.xlane.f32.xlu1 %v3116_v1 }
0x14e2   :  { %3464 = vrot.lane.b32.xlu1 %v6413_v43, %s6086_s11 }
0x14e6   :  { %3462 = vrot.lane.b32.xlu1 %v6413_v43, %s6085_s10 }
0x14ea   :  { %3540 = vrot.lane.b32.xlu1 %v6411_v38, %s6085_s10 }
0x1525   :  { %v2790_v3 = vpop.xlane.xlu0 %2789 }
0x1526   :  { %5957 = vrcp.f32 %v2790_v3 }
0x1529   :  { %v2793_v4 = vpop.xlane.xlu1 %2792  ;;  %v2805_v5 = vpop.permute.xlu0 %2804 }
0x152a   :  { %5959 = vrcp.f32 %v2793_v4  ;;  %5598 = vmatpush3.msra.mxu1 %v2805_v5 }
0x152b   :  { %5602 = vmatprep.subr.mxu1 %v6078_v12 }
0x152d   :  { %v2960_v24 = vpop.permute.xlu1 %2959  ;;  %v2958_v17 = vpop.permute.xlu0 %2957 }
0x1530   :  { %v5958_v10 = vpop.eup %5957 }
0x1531   :  { %v2796_v13 = vmul.f32 %v5958_v10, %v2790_v3 }
0x1533   :  { %v2798_v14 = vsub.f32 2.0, %v2796_v13 }
0x1534   :  { %v5960_v15 = vpop.eup %5959 }
0x1535   :  { %v2800_v18 = vmul.f32 %v5958_v10, %v2798_v14  ;;  %v2797_v19 = vmul.f32 %v5960_v15, %v2793_v4 }
0x1537   :  { %v2802_v20 = vmul.f32 %v5954_v61, %v2800_v18  ;;  %v2799_v21 = vsub.f32 2.0, %v2797_v19 }
0x1539   :  { %v2801_v22 = vmul.f32 %v5960_v15, %v2799_v21  ;;  %5600 = vmatmul.mubr.msk.f32.vlgmr.msra.gmra.mrb[32].mxu1 %vm295_vm6, %v2802_v20 }
0x153a   :  { %5603 = vmatpush3.msra.mxu1 %v2881_v2  ;;  %5604 = vmatprep.mubr.msk.f32.mxu1 %vm6079_vm4, %v6078_v12 }
0x153b   :  { %v2803_v23 = vmul.f32 %v5956_v63, %v2801_v22  ;;  %5607 = vmatprep.subr.mxu1 %v6078_v12 }
0x153d   :  { %5605 = vmatmul.mubr.msk.f32.vlgmr.msra.gmra.mrb[34].mxu1 %vm295_vm6, %v2803_v23 }
0x153e   :  { %5609 = vmatprep.mubr.msk.f32.mxu1 %vm6079_vm4, %v6078_v12 }
0x1541   :  { %5608 = vmatpush3.xpose.msk.msra.mxu1 %vm143_vm5, %v2960_v24 }
0x1542   :  { %5617 = vmatprep.subr.mxu1 %v6078_v12 }
0x1544   :  { %5610 = vmatmul.mubr.msk.f32.vlgmr.msra.gmra.mrb[36].mxu1 %vm143_vm5, %v2958_v17 }
0x1545   :  { %5619 = vmatprep.mubr.msk.f32.mxu1 %vm6079_vm4, %v6078_v12 }
0x155e   :  { %v3118_v25 = vpop.xlane.xlu1 %3117 }
0x155f   :  { %v3120_v28 = vsub.f32 %v3109_v51, %v3118_v25 }
0x1561   :  { %v3123_v29 = vmul.f32 1.442695, %v3120_v28 }
0x1562   :  { %v3465_v41 = vpop.permute.xlu1 %3464 }
0x1563   :  { %5961 = vpow2.f32 %v3123_v29  ;;  %v3293_v29 = vld [vmem:[#allocation5 + $0x140] sm:$0x3f] }
0x1566   :  { %v3463_v48 = vpop.permute.xlu1 %3462 }
0x156a   :  { %v3541_v51 = vpop.permute.xlu1 %3540 }
0x156d   :  { %v5962_v30 = vpop.eup %5961 }
0x156e   :  { %v3128_v31 = vsel %vm295_vm6, %v5962_v30, 0.0 }
0x156f   :  { %3129 = vadd.xlane.f32.xlu0 %v3128_v31 }
0x1585   :  { %3217 = vrot.lane.b32.xlu0 %v6411_v38, %s6084_s9 }
0x1589   :  { %3542 = vrot.lane.b32.xlu0 %v6411_v38, %s6086_s11 }
0x15fc   :  { %v3130_v32 = vpop.xlane.xlu0 %3129 }
0x15fd   :  { %5963 = vrcp.f32 %v3130_v32 }
0x1600   :  { %v3218_v33 = vpop.permute.xlu0 %3217 }
0x1601   :  { %5623 = vmatpush3.msra.mxu0 %v3218_v33 }
0x1602   :  { %5637 = vmatprep.subr.mxu0 %v6078_v12 }
0x1604   :  { %v3543_v50 = vpop.permute.xlu0 %3542 }
0x1607   :  { %v5964_v34 = vpop.eup %5963 }
0x1608   :  { %v3134_v39 = vmul.f32 %v5964_v34, %v3130_v32 }
0x160a   :  { %v3136_v16 = vsub.f32 2.0, %v3134_v39 }
0x160c   :  { %v3138_v42 = vmul.f32 %v5964_v34, %v3136_v16  ;;  %v6478_v44 = vpop.f32.mrb[32].mxu1 }
0x160d   :  { %v5601_v45 = vpop.f32.mrb[33].mxu1 }
0x160e   :  { %v3140_v46 = vmul.f32 %v5962_v30, %v3138_v42  ;;  %v2956_v30 = vld [vmem:[#allocation5 + $0x138] sm:$0x3f] }
0x1610   :  { %v6480_v47 = vpop.f32.mrb[34].mxu1  ;;  %5625 = vmatmul.mubr.msk.f32.vlgmr.msra.gmra.mrb[24].mxu0 %vm295_vm6, %v3140_v46 }
0x1611   :  { %5638 = vmatpush3.xpose.msk.msra.mxu0 %vm143_vm5, %v3465_v41  ;;  %v5606_v49 = vpop.f32.mrb[35].mxu1  ;;  %5639 = vmatprep.mubr.msk.f32.mxu0 %vm6079_vm4, %v6078_v12 }
0x1612   :  { %5642 = vmatprep.subr.mxu0 %v6078_v12 }
0x1614   :  { %5640 = vmatmul.mubr.msk.f32.vlgmr.msra.gmra.mrb[26].mxu0 %vm143_vm5, %v3463_v48 }
0x1615   :  { %5643 = vmatpush3.xpose.msk.msra.mxu0 %vm143_vm5, %v3543_v50  ;;  %5644 = vmatprep.mubr.msk.f32.mxu0 %vm6079_vm4, %v6078_v12 }
0x1616   :  { %5652 = vmatprep.subr.mxu0 %v6078_v12 }
0x1617   :  { %v3031_v52 = vpop.f32.mrb[36].mxu1 }
0x1618   :  { %v5611_v55 = vpop.f32.mrb[37].mxu1  ;;  %v3113_v56 = vsel %vm295_vm6, %v3031_v52, -inf  ;;  %5645 = vmatmul.mubr.msk.f32.vlgmr.msra.gmra.mrb[28].mxu0 %vm143_vm5, %v3541_v51 }
0x1619   :  { %3114 = vmax.xlane.f32.xlu0 %v3113_v56  ;;  %5654 = vmatprep.mubr.msk.f32.mxu0 %vm6079_vm4, %v6078_v12 }
0x162f   :  { %3141 = vrot.lane.b32.xlu0 %v6413_v43, %s6084_s9 }
0x1633   :  { %3646 = vrot.lane.b32.xlu0 %v6413_v43, %s6087_s12 }
0x1637   :  { %3887 = vrot.lane.b32.xlu0 %v6413_v43, %s6088_s13 }
0x163b   :  { %3885 = vrot.lane.b32.xlu0 %v6413_v43, %s6089_s14 }
0x163f   :  { %3965 = vrot.lane.b32.xlu0 %v6411_v38, %s6088_s13 }
0x1643   :  { %3963 = vrot.lane.b32.xlu0 %v6411_v38, %s6089_s14 }
0x16a6   :  { %v3115_v11 = vpop.xlane.xlu0 %3114 }
0x16a7   :  { %v3119_v9 = vsub.f32 %v3031_v52, %v3115_v11  ;;  %v3798_v11 = vld [vmem:[#allocation5 + $0x148] sm:$0x3f] }
0x16a9   :  { %v3121_v57 = vmul.f32 1.442695, %v3119_v9 }
0x16aa   :  { %v3142_v54 = vpop.permute.xlu0 %3141 }
0x16ab   :  { %5965 = vpow2.f32 %v3121_v57  ;;  %5618 = vmatpush3.msra.mxu1 %v3142_v54 }
0x16ac   :  { %5627 = vmatprep.subr.msk.mxu1 %vm61_vm0, %v3293_v29 }
0x16ae   :  { %v3647_v39 = vpop.permute.xlu0 %3646 }
0x16b2   :  { %v3888_v46 = vpop.permute.xlu0 %3887 }
0x16b5   :  { %v5966_v58 = vpop.eup %5965 }
0x16b6   :  { %v3125_v59 = vsel %vm295_vm6, %v5966_v58, 0.0  ;;  %v3886_v52 = vpop.permute.xlu0 %3885 }
0x16b7   :  { %3126 = vadd.xlane.f32.xlu1 %v3125_v59 }
0x16ba   :  { %v3966_v59 = vpop.permute.xlu0 %3965 }
0x16e3   :  { %v3289_v60 = vpop.f32.mrb[24].mxu0 }
0x16e4   :  { %v5626_v61 = vpop.f32.mrb[25].mxu0 }
0x16e7   :  { %v3536_v62 = vpop.f32.mrb[26].mxu0 }
0x16e8   :  { %v5641_v63 = vpop.f32.mrb[27].mxu0  ;;  %v3618_v0 = vsel %vm295_vm6, %v3536_v62, -inf }
0x16e9   :  { %3619 = vmax.xlane.f32.xlu1 %v3618_v0 }
0x16eb   :  { %v3614_v1 = vpop.f32.mrb[28].mxu0 }
0x16ec   :  { %v5646_v2 = vpop.f32.mrb[29].mxu0  ;;  %v3621_v3 = vsel %vm295_vm6, %v3614_v1, -inf }
0x16ed   :  { %3622 = vmax.xlane.f32.xlu1 %v3621_v3 }
0x1744   :  { %v3127_v4 = vpop.xlane.xlu1 %3126 }
0x1745   :  { %5967 = vrcp.f32 %v3127_v4 }
0x174f   :  { %v5968_v5 = vpop.eup %5967 }
0x1750   :  { %v3133_v10 = vmul.f32 %v5968_v5, %v3127_v4 }
0x1752   :  { %v3135_v13 = vsub.f32 2.0, %v3133_v10 }
0x1754   :  { %v3137_v14 = vmul.f32 %v5968_v5, %v3135_v13 }
0x1756   :  { %v3139_v15 = vmul.f32 %v5966_v58, %v3137_v14 }
0x1758   :  { %5620 = vmatmul.mubr.msk.f32.vlgmr.msra.gmra.mrb[38].mxu1 %vm295_vm6, %v3139_v15 }
0x1759   :  { %5628 = vmatpush3.msk.msra.mxu1 %vm61_vm0, %v3293_v29 }
0x175a   :  { %5632 = vmatprep.subr.msk.mxu1 %vm61_vm0, %v2956_v30 }
0x1776   :  { %v3620_v18 = vpop.xlane.xlu1 %3619 }
0x1777   :  { %v3624_v19 = vsub.f32 %v3536_v62, %v3620_v18  ;;  %v3964_v62 = vpop.permute.xlu0 %3963 }
0x1779   :  { %v3626_v20 = vmul.f32 1.442695, %v3624_v19 }
0x177a   :  { %v3623_v21 = vpop.xlane.xlu1 %3622 }
0x177b   :  { %5969 = vpow2.f32 %v3626_v20  ;;  %v3625_v22 = vsub.f32 %v3614_v1, %v3623_v21 }
0x177d   :  { %v3628_v23 = vmul.f32 1.442695, %v3625_v22 }
0x177f   :  { %5971 = vpow2.f32 %v3628_v23 }
0x1785   :  { %v5970_v24 = vpop.eup %5969 }
0x1786   :  { %v3630_v17 = vsel %vm295_vm6, %v5970_v24, 0.0 }
0x1787   :  { %3631 = vadd.xlane.f32.xlu1 %v3630_v17 }
0x1789   :  { %v5972_v25 = vpop.eup %5971 }
0x178a   :  { %v3633_v28 = vsel %vm295_vm6, %v5972_v25, 0.0 }
0x178b   :  { %3634 = vadd.xlane.f32.xlu1 %v3633_v28 }
0x179c   :  { %3722 = vrot.lane.b32.xlu1 %v6411_v38, %s6087_s12 }
0x1814   :  { %v3632_v31 = vpop.xlane.xlu1 %3631 }
0x1818   :  { %v3635_v32 = vpop.xlane.xlu1 %3634 }
0x1819   :  { %5973 = vrcp.f32 %v3635_v32 }
0x181a   :  { %5975 = vrcp.f32 %v3632_v31 }
0x181c   :  { %v3723_v33 = vpop.permute.xlu1 %3722 }
0x181d   :  { %5653 = vmatpush3.msra.mxu0 %v3723_v33 }
0x181e   :  { %5662 = vmatprep.subr.mxu0 %v6078_v12 }
0x1823   :  { %v5974_v34 = vpop.eup %5973 }
0x1824   :  { %v3639_v16 = vmul.f32 %v5974_v34, %v3635_v32  ;;  %v5976_v42 = vpop.eup %5975 }
0x1825   :  { %v3638_v49 = vmul.f32 %v5976_v42, %v3632_v31 }
0x1826   :  { %v3641_v41 = vsub.f32 2.0, %v3639_v16 }
0x1827   :  { %v3640_v55 = vsub.f32 2.0, %v3638_v49 }
0x1828   :  { %v3643_v45 = vmul.f32 %v5974_v34, %v3641_v41 }
0x1829   :  { %v3642_v56 = vmul.f32 %v5976_v42, %v3640_v55  ;;  %v4221_v55 = vld [vmem:[#allocation5 + $0x150] sm:$0x3f] }
0x182a   :  { %v3645_v48 = vmul.f32 %v5972_v25, %v3643_v45 }
0x182b   :  { %v3213_v50 = vpop.f32.mrb[38].mxu1 }
0x182c   :  { %v5621_v51 = vpop.f32.mrb[39].mxu1  ;;  %5629 = vmatprep.mubr.msk.f32.mxu1 %vm143_vm5, %v3213_v50  ;;  %5655 = vmatmul.mubr.msk.f32.vlgmr.msra.gmra.mrb[30].mxu0 %vm295_vm6, %v3645_v48 }
0x182d   :  { %5630 = vmatmul.mubr.msk.f32.vlgmr.msra.gmra.mrb[40].mxu1 %vm143_vm5, %v3289_v60  ;;  %5663 = vmatpush3.xpose.msk.msra.mxu0 %vm143_vm5, %v3888_v46 }
0x182e   :  { %5634 = vmatprep.mubr.msk.f32.mxu1 %vm143_vm5, %v6478_v44  ;;  %5664 = vmatprep.mubr.msk.f32.mxu0 %vm6079_vm4, %v6078_v12  ;;  %v3644_v44 = vmul.f32 %v5970_v24, %v3642_v56 }
0x182f   :  { %5633 = vmatpush3.msk.msra.mxu1 %vm61_vm0, %v2956_v30  ;;  %5672 = vmatprep.subr.mxu0 %v6078_v12 }
0x1830   :  { %5665 = vmatmul.mubr.msk.f32.vlgmr.msra.gmra.mrb[32].mxu0 %vm143_vm5, %v3886_v52  ;;  %5647 = vmatprep.subr.mxu1 %v6078_v12 }
0x1831   :  { %5674 = vmatprep.mubr.msk.f32.mxu0 %vm6079_vm4, %v6078_v12 }
0x1835   :  { %5635 = vmatmul.mubr.msk.f32.vlgmr.msra.gmra.mrb[40].mxu1 %vm143_vm5, %v6480_v47 }
0x1836   :  { %5648 = vmatpush3.msra.mxu1 %v3647_v39  ;;  %5649 = vmatprep.mubr.msk.f32.mxu1 %vm6079_vm4, %v6078_v12 }
0x1837   :  { %5657 = vmatprep.subr.msk.mxu1 %vm61_vm0, %v3798_v11 }
0x1839   :  { %5650 = vmatmul.mubr.msk.f32.vlgmr.msra.gmra.mrb[42].mxu1 %vm295_vm6, %v3644_v44 }
0x183a   :  { %5658 = vmatpush3.msk.msra.mxu1 %vm61_vm0, %v3798_v11 }
0x183b   :  { %5667 = vmatprep.subr.mxu1 %v6078_v12 }
0x18ff   :  { %v3794_v9 = vpop.f32.mrb[30].mxu0 }
0x1900   :  { %v5656_v57 = vpop.f32.mrb[31].mxu0 }
0x1903   :  { %v3959_v54 = vpop.f32.mrb[32].mxu0 }
0x1904   :  { %v5666_v58 = vpop.f32.mrb[33].mxu0  ;;  %v4041_v47 = vsel %vm295_vm6, %v3959_v54, -inf }
0x1905   :  { %4042 = vmax.xlane.f32.xlu1 %v4041_v47 }
0x190c   :  { %v3718_v60 = vpop.f32.mrb[42].mxu1 }
0x190d   :  { %v5651_v61 = vpop.f32.mrb[43].mxu1  ;;  %5659 = vmatprep.mubr.msk.f32.mxu1 %vm143_vm5, %v3718_v60 }
0x190e   :  { %5660 = vmatmul.mubr.msk.f32.vlgmr.msra.gmra.mrb[40].mxu1 %vm143_vm5, %v3794_v9 }
0x190f   :  { %5668 = vmatpush3.xpose.msk.msra.mxu1 %vm143_vm5, %v3966_v59  ;;  %5669 = vmatprep.mubr.msk.f32.mxu1 %vm6079_vm4, %v6078_v12 }
0x1910   :  { %5677 = vmatprep.subr.mxu1 %v6078_v12 }
0x1912   :  { %5670 = vmatmul.mubr.msk.f32.vlgmr.msra.gmra.mrb[44].mxu1 %vm143_vm5, %v3964_v62 }
0x1913   :  { %5679 = vmatprep.mubr.msk.f32.mxu1 %vm6079_vm4, %v6078_v12 }
0x1916   :  { %4310 = vrot.lane.b32.xlu1 %v6413_v43, %s6090_s15 }
0x191a   :  { %4308 = vrot.lane.b32.xlu1 %v6413_v43, %s6091_s16 }
0x191e   :  { %4386 = vrot.lane.b32.xlu1 %v6411_v38, %s6091_s16 }
0x1992   :  { %v4043_v63 = vpop.xlane.xlu1 %4042 }
0x1993   :  { %v4047_v0 = vsub.f32 %v3959_v54, %v4043_v63 }
0x1995   :  { %v4049_v1 = vmul.f32 1.442695, %v4047_v0 }
0x1996   :  { %v4311_v20 = vpop.permute.xlu1 %4310 }
0x1997   :  { %5977 = vpow2.f32 %v4049_v1 }
0x199a   :  { %v4309_v23 = vpop.permute.xlu1 %4308 }
0x199e   :  { %v4387_v24 = vpop.permute.xlu1 %4386 }
0x19a1   :  { %v5978_v2 = vpop.eup %5977 }
0x19a2   :  { %v4053_v3 = vsel %vm295_vm6, %v5978_v2, 0.0 }
0x19a3   :  { %4054 = vadd.xlane.f32.xlu0 %v4053_v3 }
0x19b9   :  { %4069 = vrot.lane.b32.xlu0 %v6413_v43, %s6092_s17 }
0x19bd   :  { %4388 = vrot.lane.b32.xlu0 %v6411_v38, %s6090_s15 }
0x19e5   :  { %v4037_v4 = vpop.f32.mrb[44].mxu1 }
0x19e6   :  { %v5671_v5 = vpop.f32.mrb[45].mxu1  ;;  %v4044_v10 = vsel %vm295_vm6, %v4037_v4, -inf }
0x19e7   :  { %4045 = vmax.xlane.f32.xlu0 %v4044_v10 }
0x19fd   :  { %4145 = vrot.lane.b32.xlu0 %v6411_v38, %s6092_s17 }
0x1a01   :  { %4492 = vrot.lane.b32.xlu0 %v6413_v43, %s6093_s18 }
0x1a30   :  { %v4055_v13 = vpop.xlane.xlu0 %4054 }
0x1a31   :  { %5979 = vrcp.f32 %v4055_v13 }
0x1a34   :  { %v4070_v14 = vpop.permute.xlu0 %4069 }
0x1a35   :  { %5673 = vmatpush3.msra.mxu0 %v4070_v14 }
0x1a36   :  { %5687 = vmatprep.subr.mxu0 %v6078_v12 }
0x1a38   :  { %v4389_v43 = vpop.permute.xlu0 %4388 }
0x1a3b   :  { %v5980_v15 = vpop.eup %5979 }
0x1a3c   :  { %v4061_v18 = vmul.f32 %v5980_v15, %v4055_v13 }
0x1a3e   :  { %v4063_v19 = vsub.f32 2.0, %v4061_v18 }
0x1a40   :  { %v4065_v21 = vmul.f32 %v5980_v15, %v4063_v19 }
0x1a42   :  { %v4067_v22 = vmul.f32 %v5978_v2, %v4065_v21 }
0x1a44   :  { %5675 = vmatmul.mubr.msk.f32.vlgmr.msra.gmra.mrb[34].mxu0 %vm295_vm6, %v4067_v22 }
0x1a45   :  { %5688 = vmatpush3.xpose.msk.msra.mxu0 %vm143_vm5, %v4311_v20  ;;  %5689 = vmatprep.mubr.msk.f32.mxu0 %vm6079_vm4, %v6078_v12  ;;  %v4644_v20 = vld [vmem:[#allocation5 + $0x158] sm:$0x3f] }
0x1a46   :  { %5692 = vmatprep.subr.mxu0 %v6078_v12 }
0x1a48   :  { %5690 = vmatmul.mubr.msk.f32.vlgmr.msra.gmra.mrb[36].mxu0 %vm143_vm5, %v4309_v23 }
0x1a49   :  { %5693 = vmatpush3.xpose.msk.msra.mxu0 %vm143_vm5, %v4389_v43  ;;  %5694 = vmatprep.mubr.msk.f32.mxu0 %vm6079_vm4, %v6078_v12 }
0x1a4a   :  { %5702 = vmatprep.subr.mxu0 %v6078_v12 }
0x1a4c   :  { %5695 = vmatmul.mubr.msk.f32.vlgmr.msra.gmra.mrb[38].mxu0 %vm143_vm5, %v4387_v24  ;;  %v6603_v24 = vld [vmem:[#allocation5 + $0x208] sm:$0x3f] }
0x1a4d   :  { %5704 = vmatprep.mubr.msk.f32.mxu0 %vm6079_vm4, %v6078_v12 }
0x1a74   :  { %v4046_v17 = vpop.xlane.xlu0 %4045 }
0x1a75   :  { %v4048_v25 = vsub.f32 %v4037_v4, %v4046_v17  ;;  %v4735_v17 = vrot.slane %v6603_v24, %v2254_v37 }
0x1a77   :  { %v4051_v28 = vmul.f32 1.442695, %v4048_v25 }
0x1a78   :  { %v4146_v29 = vpop.permute.xlu0 %4145 }
0x1a79   :  { %5981 = vpow2.f32 %v4051_v28  ;;  %5678 = vmatpush3.msra.mxu1 %v4146_v29 }
0x1a7a   :  { %5682 = vmatprep.subr.msk.mxu1 %vm61_vm0, %v4221_v55 }
0x1a7c   :  { %v4493_v62 = vpop.permute.xlu0 %4492 }
0x1a83   :  { %v5982_v30 = vpop.eup %5981 }
0x1a84   :  { %v4056_v31 = vsel %vm295_vm6, %v5982_v30, 0.0 }
0x1a85   :  { %4057 = vadd.xlane.f32.xlu1 %v4056_v31 }
0x1b12   :  { %v4058_v32 = vpop.xlane.xlu1 %4057 }
0x1b13   :  { %5983 = vrcp.f32 %v4058_v32 }
0x1b17   :  { %v4141_v33 = vpop.f32.mrb[34].mxu0 }
0x1b18   :  { %v5676_v34 = vpop.f32.mrb[35].mxu0 }
0x1b1b   :  { %v4382_v39 = vpop.f32.mrb[36].mxu0 }
0x1b1c   :  { %v5691_v16 = vpop.f32.mrb[37].mxu0  ;;  %v4464_v41 = vsel %vm295_vm6, %v4382_v39, -inf }
0x1b1d   :  { %v5984_v42 = vpop.eup %5983  ;;  %4465 = vmax.xlane.f32.xlu1 %v4464_v41 }
0x1b1e   :  { %v4062_v45 = vmul.f32 %v5984_v42, %v4058_v32 }
0x1b1f   :  { %v4460_v46 = vpop.f32.mrb[38].mxu0 }
0x1b20   :  { %v4064_v48 = vsub.f32 2.0, %v4062_v45  ;;  %v5696_v49 = vpop.f32.mrb[39].mxu0  ;;  %v4467_v50 = vsel %vm295_vm6, %v4460_v46, -inf }
0x1b21   :  { %4468 = vmax.xlane.f32.xlu1 %v4467_v50  ;;  %v4778_v49 = vld [vmem:[#allocation5 + $0x160] sm:$0xff]  ;;  %v4779_v50 = vld [vmem:[#allocation5 + $0x168] sm:$0xff] }
0x1b22   :  { %v4066_v51 = vmul.f32 %v5984_v42, %v4064_v48 }
0x1b24   :  { %v4068_v52 = vmul.f32 %v5982_v30, %v4066_v51  ;;  %v5825_v51 = vpack.c.bf16 %v4779_v50, %v4778_v49 }
0x1b26   :  { %5680 = vmatmul.mubr.msk.f32.vlgmr.msra.gmra.mrb[46].mxu1 %vm295_vm6, %v4068_v52  ;;  %v4780_v52 = vld [vmem:[#allocation5 + $0x170] sm:$0xff] }
0x1b27   :  { %5684 = vmatprep.mubr.msk.f32.mxu1 %vm143_vm5, %v4141_v33  ;;  %5683 = vmatpush3.msk.msra.mxu1 %vm61_vm0, %v4221_v55  ;;  %v4781_v55 = vld [vmem:[#allocation5 + $0x178] sm:$0x3f] }
0x1b28   :  { %5697 = vmatprep.subr.mxu1 %v6078_v12 }
0x1baa   :  { %v4466_v56 = vpop.xlane.xlu1 %4465 }
0x1bab   :  { %v4470_v44 = vsub.f32 %v4382_v39, %v4466_v56  ;;  %v5829_v56 = vpack.c.bf16 %v4781_v55, %v4780_v52 }
0x1bad   :  { %v4472_v11 = vmul.f32 1.442695, %v4470_v44  ;;  %v4873_v44 = vld [vmem:[#allocation5 + $0x188] sm:$0xff] }
0x1bae   :  { %v4469_v9 = vpop.xlane.xlu1 %4468 }
0x1baf   :  { %5985 = vpow2.f32 %v4472_v11  ;;  %v4471_v57 = vsub.f32 %v4460_v46, %v4469_v9  ;;  %v4874_v11 = vld [vmem:[#allocation5 + $0x190] sm:$0xff]  ;;  %v4875_v9 = vld [vmem:[#allocation5 + $0x198] sm:$0xff] }
0x1bb1   :  { %v4474_v54 = vmul.f32 1.442695, %v4471_v57  ;;  %v5835_v57 = vpack.c.bf16 %v4874_v11, %v4873_v44 }
0x1bb3   :  { %5987 = vpow2.f32 %v4474_v54  ;;  %v4876_v54 = vld [vmem:[#allocation5 + $0x1a0] sm:$0xff] }
0x1bb9   :  { %v5986_v58 = vpop.eup %5985 }
0x1bba   :  { %v4476_v47 = vsel %vm295_vm6, %v5986_v58, 0.0 }
0x1bbb   :  { %4477 = vadd.xlane.f32.xlu1 %v4476_v47  ;;  %v4877_v47 = vld [vmem:[#allocation5 + $0x1a8] sm:$0xff] }
0x1bbd   :  { %v5988_v59 = vpop.eup %5987 }
0x1bbe   :  { %v4479_v60 = vsel %vm295_vm6, %v5988_v59, 0.0 }
0x1bbf   :  { %4480 = vadd.xlane.f32.xlu1 %v4479_v60 }
0x1bd0   :  { %4568 = vrot.lane.b32.xlu1 %v6411_v38, %s6093_s18 }
0x1bf9   :  { %v4217_v61 = vpop.f32.mrb[46].mxu1 }
0x1bfa   :  { %v5681_v63 = vpop.f32.mrb[47].mxu1  ;;  %5685 = vmatmul.mubr.msk.f32.vlgmr.msra.gmra.mrb[40].mxu1 %vm143_vm5, %v4217_v61  ;;  %v4879_v61 = vld [vmem:[#allocation5 + $0x1b8] sm:$0xff] }
0x1bfb   :  { %5698 = vmatpush3.msra.mxu1 %v4493_v62  ;;  %5699 = vmatprep.mubr.msk.f32.mxu1 %vm6079_vm4, %v6078_v12  ;;  %v4880_v62 = vld [vmem:[#allocation5 + $0x1c0] sm:$0xff]  ;;  %v4881_v63 = vld [vmem:[#allocation5 + $0x1c8] sm:$0xff] }
0x1bfc   :  { %5707 = vmatprep.subr.msk.mxu1 %vm61_vm0, %v4644_v20  ;;  %v5847_v8 = vpack.c.bf16 %v4880_v62, %v4879_v61 }
0x1c48   :  { %v4478_v0 = vpop.xlane.xlu1 %4477 }
0x1c49   :  { %5989 = vrcp.f32 %v4478_v0 }
0x1c4c   :  { %v4481_v1 = vpop.xlane.xlu1 %4480 }
0x1c4d   :  { %5991 = vrcp.f32 %v4481_v1 }
0x1c50   :  { %v4569_v2 = vpop.permute.xlu1 %4568 }
0x1c51   :  { %5703 = vmatpush3.msra.mxu0 %v4569_v2  ;;  %v4883_v2 = vld [vmem:[#allocation5 + $0x1d8] sm:$0xff] }
0x1c52   :  { %5826 = vmatprep.subr.bf16.mxu0 %v5825_v51 }
0x1c53   :  { %v5990_v3 = vpop.eup %5989 }
0x1c54   :  { %v4484_v4 = vmul.f32 %v5990_v3, %v4478_v0  ;;  %v4882_v0 = vld [vmem:[#allocation5 + $0x1d0] sm:$0xff] }
0x1c56   :  { %v4486_v5 = vsub.f32 2.0, %v4484_v4 }
0x1c57   :  { %v5992_v10 = vpop.eup %5991 }
0x1c58   :  { %v4488_v38 = vmul.f32 %v5990_v3, %v4486_v5  ;;  %v4485_v13 = vmul.f32 %v5992_v10, %v4481_v1  ;;  %v5851_v1 = vpack.c.bf16 %v4882_v0, %v4881_v63  ;;  %v4884_v3 = vld [vmem:[#allocation5 + $0x1e0] sm:$0xff]  ;;  %v4885_v5 = vld [vmem:[#allocation5 + $0x1e8] sm:$0xff]  ;;  %v4999_v0 = vrot.slane %v6603_v24, %v2519_v26 }
0x1c59   :  { %v5855_v4 = vpack.c.bf16 %v4884_v3, %v4883_v2 }
0x1c5a   :  { %v4490_v14 = vmul.f32 %v5986_v58, %v4488_v38  ;;  %v4487_v15 = vsub.f32 2.0, %v4485_v13  ;;  %v5839_v58 = vpack.c.bf16 %v4876_v54, %v4875_v9 }
0x1c5c   :  { %v4489_v18 = vmul.f32 %v5992_v10, %v4487_v15  ;;  %5700 = vmatmul.mubr.msk.f32.vlgmr.msra.gmra.mrb[48].mxu1 %vm295_vm6, %v4490_v14  ;;  %v4886_v10 = vld [vmem:[#allocation5 + $0x1f0] sm:$0xff] }
0x1c5d   :  { %5708 = vmatpush3.msk.msra.mxu1 %vm61_vm0, %v4644_v20  ;;  %v5859_v38 = vpack.c.bf16 %v4886_v10, %v4885_v5 }
0x1c5e   :  { %v4491_v19 = vmul.f32 %v5988_v59, %v4489_v18  ;;  %v4878_v59 = vld [vmem:[#allocation5 + $0x1b0] sm:$0xff]  ;;  %5836 = vmatprep.subr.bf16.mxu1 %v5835_v57 }
0x1c5f   :  { %v5843_v60 = vpack.c.bf16 %v4878_v59, %v4877_v47  ;;  %v5008_v47 = vld [vmem:[#allocation5 + $0x8] sm:$0x7] }
0x1c60   :  { %5705 = vmatmul.mubr.msk.f32.vlgmr.msra.gmra.mrb[40].mxu0 %vm295_vm6, %v4491_v19 }
0x1c61   :  { %5828 = vmatpush3.bf16.msra.mxu0 %v5825_v51 }
0x1c62   :  { %5831 = vmatprep.subr.msk.bf16.mxu0 %vm6135_vm3, %v5829_v56 }
0x1c65   :  { %5834 = vmatpush3.bf16.msk.msra.mxu0 %vm6135_vm3, %v5829_v56 }
0x1c66   :  { %5758 = vmatprep.subr.mxu0 %v6078_v12 }
0x1d2f   :  { %v4564_v21 = vpop.f32.mrb[48].mxu1 }
0x1d30   :  { %v5701_v22 = vpop.f32.mrb[49].mxu1  ;;  %5709 = vmatprep.mubr.msk.f32.mxu1 %vm143_vm5, %v4564_v21  ;;  %v4769_v21 = vrot.slane %v6603_v24, %v2289_v6  ;;  %v4887_v6 = vld [vmem:[#allocation5 + $0x1f8] sm:$0xff] }
0x1d33   :  { %v4640_v23 = vpop.f32.mrb[40].mxu0 }
0x1d34   :  { %v5706_v43 = vpop.f32.mrb[41].mxu0  ;;  %5710 = vmatmul.mubr.msk.f32.vlgmr.msra.gmra.mrb[40].mxu1 %vm143_vm5, %v4640_v23 }
0x1d35   :  { %5838 = vmatpush3.bf16.msra.mxu1 %v5835_v57  ;;  %v4775_v43 = vrot.slane %v6603_v24, %v2295_v7  ;;  %v5215_v7 = vld [vmem:[#allocation5 + $0x180] ss:$0 sm:$0xff] }
0x1d36   :  { %5840 = vmatprep.subr.bf16.mxu1 %v5839_v58 }
0x1d39   :  { %5842 = vmatpush3.bf16.msra.mxu1 %v5839_v58 }
0x1d3a   :  { %5844 = vmatprep.subr.bf16.mxu1 %v5843_v60 }
0x1d3d   :  { %5846 = vmatpush3.bf16.msra.mxu1 %v5843_v60 }
0x1d3e   :  { %5848 = vmatprep.subr.bf16.mxu1 %v5847_v8 }
0x1d41   :  { %5850 = vmatpush3.bf16.msra.mxu1 %v5847_v8 }
0x1d42   :  { %5852 = vmatprep.subr.bf16.mxu1 %v5851_v1 }
0x1d45   :  { %5854 = vmatpush3.bf16.msra.mxu1 %v5851_v1 }
0x1d46   :  { %5856 = vmatprep.subr.bf16.mxu1 %v5855_v4 }
0x1d49   :  { %5858 = vmatpush3.bf16.msra.mxu1 %v5855_v4  ;;  %v5005_v4 = vrot.slane %v6603_v24, %v2525_v27 }
0x1d4a   :  { %5860 = vmatprep.subr.bf16.mxu1 %v5859_v38 }
0x1d4d   :  { %5862 = vmatpush3.bf16.msra.mxu1 %v5859_v38 }
0x1e07   :  { %v5711_v25 = vpop.f32.mrb[40].mxu1 }
0x1e08   :  { %v4737_v28 = vadd.f32 %v5711_v25, %v4735_v17  ;;  %v4720_v29 = vpop.f32.mrb[41].mxu1 }
0x1e09   :  { %v4736_v30 = vadd.f32 %v4735_v17, %v4720_v29 }
0x1e0a   :  { %v4739_v31 = vadd.f32 %v4737_v28, %v6405_v40 }
0x1e0b   :  { %v4738_v32 = vadd.f32 %v4736_v30, %v6401_v35 }
0x1e0c   :  { %v4743_v33 = vsel %vm54_vm1, %v4739_v31, 0.0 }
0x1e0d   :  { %4744 = vadd.xlane.f32.xlu1 %v4743_v33  ;;  %v4740_v34 = vsel %vm54_vm1, %v4738_v32, 0.0 }
0x1e0e   :  { %4741 = vadd.xlane.f32.xlu0 %v4740_v34 }
0x1e9a   :  { %v4745_v39 = vpop.xlane.xlu1 %4744 }
0x1e9b   :  { %v4747_v16 = vmul.f32 0.033333335, %v4745_v39  ;;  %v4742_v41 = vpop.xlane.xlu0 %4741 }
0x1e9c   :  { %v4746_v42 = vmul.f32 0.033333335, %v4742_v41 }
0x1e9d   :  { %v6612_v45 = vsub.f32 %v4739_v31, %v4747_v16 }
0x1e9e   :  { %v6614_v37 = vsub.f32 %v4738_v32, %v4746_v42  ;;  %v4888_v32 = vld [vmem:[#allocation5 + $0x200] sm:$0xff] }
0x1e9f   :  { %v4751_v35 = vmul.f32 %v6612_v45, %v6612_v45  ;;  %v5863_v33 = vpack.c.bf16 %v4888_v32, %v4887_v6 }
0x1ea0   :  { %v4750_v46 = vmul.f32 %v6614_v37, %v6614_v37 }
0x1ea1   :  { %v4755_v48 = vsel %vm54_vm1, %v4751_v35, 0.0  ;;  %5864 = vmatprep.subr.bf16.mxu1 %v5863_v33 }
0x1ea2   :  { %v4752_v40 = vsel %vm54_vm1, %v4750_v46, 0.0  ;;  %5866 = vmatpush3.bf16.msra.mxu1 %v5863_v33 }
0x1ea3   :  { %4753 = vadd.xlane.f32.xlu0 %v4752_v40 }
0x1ea7   :  { %4756 = vadd.xlane.f32.xlu0 %v4755_v48 }
0x1f30   :  { %v4754_v13 = vpop.xlane.xlu0 %4753 }
0x1f31   :  { %v4758_v14 = vmul.f32 0.033333335, %v4754_v13 }
0x1f33   :  { %v4760_v15 = vadd.f32 1e-05, %v4758_v14 }
0x1f34   :  { %v4757_v18 = vpop.xlane.xlu0 %4756 }
0x1f35   :  { %5993 = vrsqrt.f32 %v4760_v15  ;;  %v4759_v19 = vmul.f32 0.033333335, %v4757_v18 }
0x1f37   :  { %v4761_v20 = vadd.f32 1e-05, %v4759_v19 }
0x1f39   :  { %5995 = vrsqrt.f32 %v4761_v20  ;;  %v5219_v20 = vld [vmem:[#allocation5 + $0xb] ss:$0 sm:$0xff] }
0x1f3f   :  { %v5994_v22 = vpop.eup %5993 }
0x1f40   :  { %v4764_v23 = vmul.f32 %v5994_v22, %v6614_v37  ;;  %v4892_v37 = vrot.slane %v6603_v24, %v2412_v53 }
0x1f42   :  { %v4770_v17 = vmul.f32 %v4769_v21, %v4764_v23 }
0x1f43   :  { %v5996_v25 = vpop.eup %5995 }
0x1f44   :  { %v4765_v28 = vmul.f32 %v5996_v25, %v6612_v45  ;;  %v4776_v29 = vadd.f32 %v4775_v43, %v4770_v17 }
0x1f46   :  { %v4771_v30 = vmul.f32 %v4769_v21, %v4765_v28  ;;  %5720 = vmatprep.mubr.msk.f32.mxu0 %vm54_vm1, %v4776_v29 }
0x1f48   :  { %v4777_v31 = vadd.f32 %v4775_v43, %v4771_v30 }
0x1f4a   :  { %5721 = vmatmul.mubr.msk.f32.vlgmr.msra.gmra.mrb[42].mxu0 %vm54_vm1, %v4777_v31 }
0x1f4b   :  { %5760 = vmatprep.mubr.msk.f32.mxu0 %vm6079_vm4, %v6078_v12  ;;  %5759 = vmatpush3.xpose.msk.msra.mxu0 %vm54_vm1, %v5008_v47 }
0x201d   :  { %v5722_v34 = vpop.f32.mrb[42].mxu0 }
0x201e   :  { %v4868_v39 = vadd.f32 %v5722_v34, %v5215_v7  ;;  %v4862_v16 = vpop.f32.mrb[43].mxu0 }
0x201f   :  { %v4863_v41 = vadd.f32 %v5215_v7, %v4862_v16 }
0x2020   :  { %v4872_v45 = vmax.f32 %v4868_v39, 0.0 }
0x2021   :  { %v4871_v42 = vmax.f32 %v4863_v41, 0.0 }
0x2023   :  { %5755 = vmatprep.mubr.f32.mxu1 %v4871_v42 }
0x2024   :  { %5756 = vmatmul.mubr.f32.vlgmr.msra.gmra.mrb[50].mxu1 %v4872_v45 }
0x20f7   :  { %v5757_v46 = vpop.f32.mrb[50].mxu1 }
0x20f8   :  { %v4959_v12 = vpop.f32.mrb[51].mxu1  ;;  %v4965_v40 = vadd.f32 %v5757_v46, %v4892_v37 }
0x20f9   :  { %v4960_v35 = vadd.f32 %v4959_v12, %v4892_v37 }
0x20fa   :  { %v4969_v49 = vadd.f32 %v4965_v40, %v4777_v31 }
0x20fb   :  { %v4968_v48 = vadd.f32 %v4960_v35, %v4776_v29 }
0x20fc   :  { %v4973_v51 = vsel %vm54_vm1, %v4969_v49, 0.0 }
0x20fd   :  { %v4970_v50 = vsel %vm54_vm1, %v4968_v48, 0.0 }
0x20fe   :  { %4971 = vadd.xlane.f32.xlu0 %v4970_v50 }
0x2102   :  { %4974 = vadd.xlane.f32.xlu0 %v4973_v51 }
0x218b   :  { %v4972_v52 = vpop.xlane.xlu0 %4971 }
0x218c   :  { %v4976_v55 = vmul.f32 0.033333335, %v4972_v52 }
0x218e   :  { %v4978_v56 = vsub.f32 %v4968_v48, %v4976_v55 }
0x218f   :  { %v4975_v44 = vpop.xlane.xlu0 %4974 }
0x2190   :  { %v4977_v11 = vmul.f32 0.033333335, %v4975_v44  ;;  %v4980_v9 = vmul.f32 %v4978_v56, %v4978_v56 }
0x2192   :  { %v4979_v57 = vsub.f32 %v4969_v49, %v4977_v11  ;;  %v4982_v53 = vsel %vm54_vm1, %v4980_v9, 0.0 }
0x2193   :  { %4983 = vadd.xlane.f32.xlu0 %v4982_v53 }
0x2194   :  { %v4981_v54 = vmul.f32 %v4979_v57, %v4979_v57 }
0x2196   :  { %v4985_v58 = vsel %vm54_vm1, %v4981_v54, 0.0 }
0x2197   :  { %4986 = vadd.xlane.f32.xlu1 %v4985_v58 }
0x2220   :  { %v4984_v59 = vpop.xlane.xlu0 %4983 }
0x2221   :  { %v4988_v60 = vmul.f32 0.033333335, %v4984_v59 }
0x2223   :  { %v4990_v61 = vadd.f32 1e-05, %v4988_v60 }
0x2224   :  { %v4987_v62 = vpop.xlane.xlu1 %4986 }
0x2225   :  { %5997 = vrsqrt.f32 %v4990_v61  ;;  %v4989_v8 = vmul.f32 0.033333335, %v4987_v62 }
0x2227   :  { %v4991_v63 = vadd.f32 1e-05, %v4989_v8 }
0x2229   :  { %5999 = vrsqrt.f32 %v4991_v63 }
0x222f   :  { %v5998_v1 = vpop.eup %5997 }
0x2230   :  { %v4994_v2 = vmul.f32 %v5998_v1, %v4978_v56 }
0x2232   :  { %v5000_v3 = vmul.f32 %v4999_v0, %v4994_v2 }
0x2233   :  { %v6000_v5 = vpop.eup %5999 }
0x2234   :  { %v4995_v10 = vmul.f32 %v6000_v5, %v4979_v57  ;;  %v5006_v13 = vadd.f32 %v5005_v4, %v5000_v3 }
0x2236   :  { %v5001_v38 = vmul.f32 %v4999_v0, %v4995_v10  ;;  %v5016_v15 = vrot.slane %v5006_v13, 7 }
0x2238   :  { %v5007_v14 = vadd.f32 %v5005_v4, %v5001_v38 }
0x223a   :  { %v5017_v18 = vrot.slane %v5007_v14, 6 }
0x223c   :  { %v5019_v19 = vsel %vm5018_vm7, %v5017_v18, %v5016_v15 }
0x223d   :  { %5761 = vmatmul.mubr.msk.f32.vlgmr.msra.gmra.mrb[44].mxu0 %vm54_vm1, %v5019_v19 }
0x2310   :  { %v5091_v26 = vpop.f32.mrb[44].mxu0 }
0x2311   :  { %v5092_v21 = vadd.f32 %v5219_v20, %v5091_v26  ;;  %v5762_v36 = vpop.f32.mrb[45].mxu0 }
0x2313   :  { %5096 = vst.msk [vmem:[#allocation7] sm:$0x3] %vm5095_vm8, %v5092_v21 }
0x2314   :  { %6056 = shalt.err (!%p6053_p6)
}
0x2315   :  { %s6057_s24 = scalar_lea.hbm %s6668_s2, 32 }
0x2316   :  { %p6058_p7 = scmp.ne.s32.totalorder %s6668_s2, %s6057_s24  ;;  %p6061_p8 = scmp.lt.u32.totalorder %s6057_s24, %s6668_s2 }
0x2318   :  { %p6063_p9 = pnand %p6061_p8, %p6058_p7 }
0x231a   :  { %6066 = shalt.err (!%p6063_p9)
}
0x231b   :  { %5106 = dma.vmem_to_hbm [thread:$0]  %s5104_s20, 32, %s6668_s2, [#allocation4]  }
0x231c   :  { %6071 = dma.done.wait [#allocation4], 32  }
0x231d   :  { %6072 = vsyncadd [#allocation4], 4294967264 }
0x231e   :  { %5110 = vsyncpa [#allocation3], 1 }
0x231f   :  { %5111 = vsyncpa [#allocation6], 1 }
0x2320   :  { %5112 = vsyncpa [#allocation4], 1 }

</bundles_post_ra>
